<compile_context>
chip_gen: v7x
topology: tpu7x:2x2x1
jax: 0.10.0
libtpu: 0.0.40
codegen_flags: <defaults>
</compile_context>

<pallas_src>
import functools

import jax
import jax.numpy as jnp
from jax.experimental import pallas as pl
from jax.experimental.pallas import tpu as pltpu


# ----------------------------- device heuristics -----------------------------

def _vmem_capacity_bytes():
    """Per-core VMEM capacity (v5e/v6e: 128 MiB, v7x: 64 MiB); conservative fallback."""
    try:
        cap = int(pltpu.get_tpu_info().vmem_capacity_bytes)
        if cap > 0:
            return cap
    except Exception:
        pass
    try:
        kind = jax.devices()[0].device_kind.lower()
        return (64 << 20) if "7" in kind else (128 << 20)
    except Exception:
        return 64 << 20


def _num_tensorcores():
    """TensorCores a single pallas_call can span via a 'parallel' grid axis."""
    try:
        kind = jax.devices()[0].device_kind.lower()
    except Exception:
        return 2
    if "lite" in kind or "v5e" in kind or "v6e" in kind:
        return 1          # v5e / v6e: one TensorCore per chip
    return 2              # v4 / v5p megacore, v7x: two TensorCores


def _pick_batch_block(N, L, C_in, C_out, K, in_bytes, out_bytes, vmem_budget, n_cores):
    """Largest batch block whose working set fits the VMEM budget.

    Working set = double-buffered in/out pipeline blocks + in-kernel f32 live values
    (no im2col slab any more — taps are materialized one at a time).  Also keeps
    grid = N // B >= n_cores (balanced when possible) so the 'parallel' axis can use
    both TensorCores on v7x, while a single-TC chip may end up with grid = 1.
    """
    def est(B):
        BL = B * L
        pipelined = 2 * C_in * BL * in_bytes + 2 * C_out * BL * out_bytes
        interm = ((K + 1) * C_in + (K + 4) * C_out + 1) * BL * 4
        return pipelined + interm

    candidates = [b for b in range(1, N + 1)
                  if N % b == 0 and ((b * L) % 128 == 0 or b == N)]
    fits = [b for b in candidates if est(b) <= vmem_budget] or [min(candidates)]
    multi = [b for b in fits if (N // b) >= n_cores]
    balanced = [b for b in multi if (N // b) % n_cores == 0]
    if balanced:
        return max(balanced)
    if multi:
        return max(multi)
    return max(fits)


# --------------------------------- kernel ------------------------------------

def temporal_block_kernel(x_ref, w1_ref, b1_ref, w2_ref, b2_ref, wd_ref, bd_ref, o_ref,
                          *, K, dilation, L, has_downsample):
    f32 = jnp.float32
    x = x_ref[...].astype(f32)                       # (C_in, B*L); f32 math everywhere
    BL = x.shape[1]

    # Causal masks, computed ONCE per grid step and shared by conv1 / conv2.
    t = jax.lax.broadcasted_iota(jnp.int32, (1, BL), 1) % L
    masks = [None] + [t >= (m * dilation) for m in range(1, K)]

    def shifted(h, m):
        # h delayed by m*dilation within each length-L batch segment (zeros in the
        # causal region; the mask also kills any wrap across segments from the roll).
        if m == 0:
            return h
        r = pltpu.roll(h, m * dilation, 1)           # XLU lane rotation (~free slot)
        return jnp.where(masks[m], r, 0.0)

    def causal_conv(h, w_ref, b_ref):
        # Per-tap MXU dots with f32 accumulation: no im2col concat / sublane repack.
        acc = b_ref[...].astype(f32) + jnp.dot(
            w_ref[0].astype(f32), h, preferred_element_type=f32)
        for m in range(1, K):
            acc = acc + jnp.dot(w_ref[m].astype(f32), shifted(h, m),
                                preferred_element_type=f32)
        return acc

    # conv1 -> chomp -> relu ; conv2 -> chomp -> relu
    # TODO(synk): dropout1/dropout2 are identity in eval mode and are not applied.
    h1 = jnp.maximum(causal_conv(x, w1_ref, b1_ref), 0.0)
    h2 = jnp.maximum(causal_conv(h1, w2_ref, b2_ref), 0.0)

    if has_downsample:
        res = (jnp.dot(wd_ref[...].astype(f32), x, preferred_element_type=f32)
               + bd_ref[...].astype(f32))
    else:
        res = x                                      # identity residual, exact f32

    o_ref[...] = jnp.maximum(h2 + res, 0.0).astype(o_ref.dtype)


# -------------------------------- wrappers ------------------------------------

def temporal_block_folded(xf, w1, b1, w2, b2, wd=None, bd=None, *,
                          seq_len, kernel_size, dilation,
                          batch_block=None, out_dtype=None):
    """TemporalBlock forward (eval) on batch-folded activations.

    xf : (C_in, N*L) activations, batch folded into the lane axis (L contiguous per
         sample).  Keep this layout across a TCN stack to avoid per-layer transpose
         round-trips through HBM.
    w1 : (K, C_out, C_in) with w1[j] = torch_conv1.weight[:, :, j];  b1: (C_out, 1)
    w2 : (K, C_out, C_out) likewise for conv2;                        b2: (C_out, 1)
    wd : (C_out, C_in) 1x1 downsample weight or None (identity; needs C_in == C_out)
    Returns (C_out, N*L) in out_dtype (default xf.dtype).
    """
    C_in, NL = xf.shape
    L = seq_len
    assert NL % L == 0, "xf lane size must be N * seq_len"
    N = NL // L
    K = kernel_size
    C_out = w1.shape[1]
    out_dtype = xf.dtype if out_dtype is None else out_dtype

    has_downsample = wd is not None
    if not has_downsample:
        assert C_in == C_out, "identity residual requires C_in == C_out"
        wd = jnp.zeros((C_out, C_in), jnp.float32)   # unused inside the kernel
        bd = jnp.zeros((C_out, 1), jnp.float32)

    # Reorder taps so index m corresponds to time shift m*dilation (PyTorch tap K-1-m).
    w1s = jnp.asarray(w1)[::-1]
    w2s = jnp.asarray(w2)[::-1]

    cap = _vmem_capacity_bytes()
    budget = min(max((cap * 3) // 4, 32 << 20), 128 << 20)
    n_cores = _num_tensorcores()
    if batch_block is None:
        batch_block = _pick_batch_block(
            N, L, C_in, C_out, K,
            jnp.dtype(xf.dtype).itemsize, jnp.dtype(out_dtype).itemsize,
            budget, n_cores)
    B = batch_block
    assert N % B == 0, "N must be divisible by batch_block"

    kern = functools.partial(temporal_block_kernel, K=K, dilation=dilation,
                             L=L, has_downsample=has_downsample)

    def _const_spec(shape, mode):
        zero = (0,) * len(shape)
        return pl.BlockSpec(shape, lambda i: zero, **mode)

    def _call(weight_mode):
        grid_spec = pltpu.PrefetchScalarGridSpec(
            num_scalar_prefetch=0,
            grid=(N // B,),
            in_specs=[
                pl.BlockSpec((C_in, B * L), lambda i: (0, i)),
                _const_spec((K, C_out, C_in), weight_mode),
                _const_spec((C_out, 1), weight_mode),
                _const_spec((K, C_out, C_out), weight_mode),
                _const_spec((C_out, 1), weight_mode),
                _const_spec((C_out, C_in), weight_mode),
                _const_spec((C_out, 1), weight_mode),
            ],
            out_specs=pl.BlockSpec((C_out, B * L), lambda i: (0, i)),
        )
        return pl.pallas_call(
            kern,
            out_shape=jax.ShapeDtypeStruct((C_out, NL), out_dtype),
            grid_spec=grid_spec,
            compiler_params=pltpu.CompilerParams(
                dimension_semantics=("parallel",),
                vmem_limit_bytes=int(budget)),
        )(xf, w1s, b1, w2s, b2, wd, bd)

    # Weights/biases have constant index_maps -> single-buffer them when supported
    # (VMEM saved goes to a bigger batch block; mainly relevant on 64 MiB v7x).
    if hasattr(pl, "Buffered"):
        try:
            return _call({"pipeline_mode": pl.Buffered(1)})
        except Exception:
            pass
    return _call({})


def temporal_block(x, w1, b1, w2, b2, wd=None, bd=None, *,
                   kernel_size, dilation, batch_block=None, io_dtype=None):
    """(N, C_in, L) -> (N, C_out, L) convenience wrapper (one fold / unfold).

    For a stack of TemporalBlocks prefer `temporal_block_folded` and keep the folded
    (C, N*L) layout between layers.  io_dtype=bf16 halves activation HBM traffic;
    in-kernel math stays f32.
    """
    N, C_in, L = x.shape
    C_out = w1.shape[1]
    in_dtype = x.dtype if io_dtype is None else io_dtype
    xf = jnp.transpose(x, (1, 0, 2)).reshape(C_in, N * L).astype(in_dtype)
    of = temporal_block_folded(xf, w1, b1, w2, b2, wd, bd,
                               seq_len=L, kernel_size=kernel_size, dilation=dilation,
                               batch_block=batch_block, out_dtype=in_dtype)
    return of.reshape(C_out, N, L).transpose(1, 0, 2)


# ------------------------------- reference ------------------------------------

def ref_temporal_block(x, w1, b1, w2, b2, wd=None, bd=None, *, kernel_size, dilation):
    """Pure-JAX reference matching the PyTorch forward (eval mode)."""
    K, d = kernel_size, dilation
    pad = (K - 1) * d
    hi = jax.lax.Precision.HIGHEST

    def causal_conv(h, w, b):
        L = h.shape[-1]
        hp = jnp.pad(h, ((0, 0), (0, 0), (pad, 0)))
        out = sum(jnp.einsum('oc,ncl->nol', w[j], hp[:, :, j * d: j * d + L],
                             precision=hi) for j in range(K))
        return out + b[None]

    h1 = jax.nn.relu(causal_conv(x, w1, b1))
    h2 = jax.nn.relu(causal_conv(h1, w2, b2))
    if wd is None:
        res = x
    else:
        res = jnp.einsum('oc,ncl->nol', wd, x, precision=hi) + bd[None]
    return jax.nn.relu(h2 + res)


# ---------------------------------- main --------------------------------------

if __name__ == "__main__":
    key = jax.random.PRNGKey(0)
    keys = jax.random.split(key, 12)

    # --- Test 1: single block, C_in != C_out (downsample path), f32 + bf16 IO ---
    # TemporalBlock(4, 8, kernel_size=3, stride=1, dilation=2, padding=4, dropout=0.2)
    N, C_IN, C_OUT, L, K, DIL = 8, 4, 8, 128, 3, 2
    x = jax.random.normal(keys[0], (N, C_IN, L), jnp.float32)
    w1 = jax.random.normal(keys[1], (K, C_OUT, C_IN), jnp.float32) * 0.3
    b1 = jax.random.normal(keys[2], (C_OUT, 1), jnp.float32) * 0.1
    w2 = jax.random.normal(keys[3], (K, C_OUT, C_OUT), jnp.float32) * 0.3
    b2 = jax.random.normal(keys[4], (C_OUT, 1), jnp.float32) * 0.1
    wd = jax.random.normal(keys[5], (C_OUT, C_IN), jnp.float32) * 0.3
    bd = jax.random.normal(keys[6], (C_OUT, 1), jnp.float32) * 0.1

    ref = ref_temporal_block(x, w1, b1, w2, b2, wd, bd, kernel_size=K, dilation=DIL)
    out = jax.block_until_ready(
        temporal_block(x, w1, b1, w2, b2, wd, bd, kernel_size=K, dilation=DIL))
    assert out.shape == (N, C_OUT, L)
    assert jnp.allclose(out, ref, atol=2e-2, rtol=2e-2), "f32 mismatch vs reference"

    out_bf = jax.block_until_ready(
        temporal_block(x, w1, b1, w2, b2, wd, bd, kernel_size=K, dilation=DIL,
                       io_dtype=jnp.bfloat16))
    assert jnp.allclose(out_bf.astype(jnp.float32), ref, atol=1e-1, rtol=1e-1), \
        "bf16-IO mismatch vs reference"

    # --- Test 2: edge case pad >= L, identity residual, batch_block = N ---
    N2, C2, L2, K2, D2 = 4, 8, 8, 3, 4            # (K-1)*dilation = 8 >= L = 8
    x2 = jax.random.normal(keys[7], (N2, C2, L2), jnp.float32)
    w21 = jax.random.normal(keys[8], (K2, C2, C2), jnp.float32) * 0.3
    w22 = jax.random.normal(keys[9], (K2, C2, C2), jnp.float32) * 0.3
    bz = jnp.zeros((C2, 1), jnp.float32)
    ref2 = ref_temporal_block(x2, w21, bz, w22, bz, None, None,
                              kernel_size=K2, dilation=D2)
    out2 = jax.block_until_ready(
        temporal_block(x2, w21, bz, w22, bz, None, None,
                       kernel_size=K2, dilation=D2, batch_block=N2))
    assert jnp.allclose(out2, ref2, atol=2e-2, rtol=2e-2), "edge-case mismatch"

    # --- Test 3: two blocks chained in the folded (C, N*L) layout (no transposes) ---
    wb1 = jax.random.normal(keys[10], (K, C_OUT, C_OUT), jnp.float32) * 0.3
    wb2 = jax.random.normal(keys[11], (K, C_OUT, C_OUT), jnp.float32) * 0.3
    xf = jnp.transpose(x, (1, 0, 2)).reshape(C_IN, N * L)
    yf = temporal_block_folded(xf, w1, b1, w2, b2, wd, bd,
                               seq_len=L, kernel_size=K, dilation=1)
    zf = temporal_block_folded(yf, wb1, b1, wb2, b2, None, None,
                               seq_len=L, kernel_size=K, dilation=2)
    z = jax.block_until_ready(zf.reshape(C_OUT, N, L).transpose(1, 0, 2))
    ref_a = ref_temporal_block(x, w1, b1, w2, b2, wd, bd, kernel_size=K, dilation=1)
    ref_z = ref_temporal_block(ref_a, wb1, b1, wb2, b2, None, None,
                               kernel_size=K, dilation=2)
    assert jnp.allclose(z, ref_z, atol=5e-2, rtol=5e-2), "stacked folded mismatch"

    print("KERNEL_OK")
</pallas_src>

<mosaic_0001>
module attributes {stable_mosaic.version = 11 : i64} {
  func.func @temporal_block_kernel(%arg0: i32, %arg1: memref<4x512xf32, #tpu.memory_space<vmem>>, %arg2: memref<3x8x4xf32, #tpu.memory_space<vmem>>, %arg3: memref<8x1xf32, #tpu.memory_space<vmem>>, %arg4: memref<3x8x8xf32, #tpu.memory_space<vmem>>, %arg5: memref<8x1xf32, #tpu.memory_space<vmem>>, %arg6: memref<8x4xf32, #tpu.memory_space<vmem>>, %arg7: memref<8x1xf32, #tpu.memory_space<vmem>>, %arg8: memref<8x512xf32, #tpu.memory_space<vmem>>) attributes {dimension_semantics = [#tpu.dimension_semantics<parallel>], iteration_bounds = array<i64: 2>, scalar_prefetch = 0 : i64, scratch_operands = 0 : i64, tpu.core_type = #tpu.core_type<tc>, window_params = [{transform_indices = @transform_0, window_bounds = array<i64: 4, 512>}, {pipeline_mode = #tpu.pipeline_mode<synchronous>, transform_indices = @transform_1, window_bounds = array<i64: 3, 8, 4>}, {pipeline_mode = #tpu.pipeline_mode<synchronous>, transform_indices = @transform_2, window_bounds = array<i64: 8, 1>}, {pipeline_mode = #tpu.pipeline_mode<synchronous>, transform_indices = @transform_3, window_bounds = array<i64: 3, 8, 8>}, {pipeline_mode = #tpu.pipeline_mode<synchronous>, transform_indices = @transform_4, window_bounds = array<i64: 8, 1>}, {pipeline_mode = #tpu.pipeline_mode<synchronous>, transform_indices = @transform_5, window_bounds = array<i64: 8, 4>}, {pipeline_mode = #tpu.pipeline_mode<synchronous>, transform_indices = @transform_6, window_bounds = array<i64: 8, 1>}, {transform_indices = @transform_7, window_bounds = array<i64: 8, 512>}]} {
    %c0 = arith.constant 0 : index
    %c0_0 = arith.constant 0 : index
    %0 = vector.load %arg1[%c0, %c0_0] : memref<4x512xf32, #tpu.memory_space<vmem>>, vector<4x512xf32>
    %1 = tpu.iota {dimensions = array<i32: 1>} : vector<1x512xi32>
    %c128_i32 = arith.constant 128 : i32
    %c0_i32 = arith.constant 0 : i32
    %2 = arith.cmpi eq, %c128_i32, %c0_i32 : i32
    %c1_i32 = arith.constant 1 : i32
    %3 = arith.select %2, %c1_i32, %c128_i32 : i32
    %4 = vector.broadcast %3 : i32 to vector<1x512xi32>
    %5 = arith.remsi %1, %4 : vector<1x512xi32>
    %c0_i32_1 = arith.constant 0 : i32
    %6 = vector.broadcast %c0_i32_1 : i32 to vector<1x512xi32>
    %7 = arith.cmpi ne, %5, %6 : vector<1x512xi32>
    %c0_i32_2 = arith.constant 0 : i32
    %8 = vector.broadcast %c0_i32_2 : i32 to vector<1x512xi32>
    %9 = arith.cmpi slt, %5, %8 : vector<1x512xi32>
    %c0_i32_3 = arith.constant 0 : i32
    %10 = arith.cmpi slt, %3, %c0_i32_3 : i32
    %11 = vector.broadcast %10 : i1 to vector<1x512xi1>
    %12 = vector.broadcast %11 : vector<1x512xi1> to vector<1x512xi1>
    %13 = arith.xori %9, %12 : vector<1x512xi1>
    %14 = arith.andi %13, %7 : vector<1x512xi1>
    %15 = vector.broadcast %3 : i32 to vector<1x512xi32>
    %16 = arith.addi %5, %15 : vector<1x512xi32>
    %17 = arith.select %14, %16, %5 : vector<1x512xi1>, vector<1x512xi32>
    %c2_i32 = arith.constant 2 : i32
    %18 = vector.broadcast %c2_i32 : i32 to vector<1x512xi32>
    %19 = arith.cmpi sge, %17, %18 : vector<1x512xi32>
    %c4_i32 = arith.constant 4 : i32
    %20 = vector.broadcast %c4_i32 : i32 to vector<1x512xi32>
    %21 = arith.cmpi sge, %17, %20 : vector<1x512xi32>
    %c0_4 = arith.constant 0 : index
    %c0_5 = arith.constant 0 : index
    %22 = vector.load %arg3[%c0_4, %c0_5] : memref<8x1xf32, #tpu.memory_space<vmem>>, vector<8x1xf32>
    %c0_6 = arith.constant 0 : index
    %c0_7 = arith.constant 0 : index
    %c0_8 = arith.constant 0 : index
    %23 = vector.load %arg2[%c0_6, %c0_7, %c0_8] : memref<3x8x4xf32, #tpu.memory_space<vmem>>, vector<1x8x4xf32>
    %24 = vector.shape_cast %23 : vector<1x8x4xf32> to vector<8x4xf32>
    %cst = arith.constant dense<0.000000e+00> : vector<8x512xf32>
    %25 = tpu.matmul %24, %0, %cst {dimension_numbers = #tpu.dot_dimension_numbers<[1], [0], [0], [1], [0, 0, 1, 1], [], []>} : vector<8x4xf32>, vector<4x512xf32>, vector<8x512xf32> -> vector<8x512xf32>
    %26 = vector.broadcast %22 : vector<8x1xf32> to vector<8x512xf32>
    %27 = arith.addf %26, %25 : vector<8x512xf32>
    %c1 = arith.constant 1 : index
    %c0_9 = arith.constant 0 : index
    %c0_10 = arith.constant 0 : index
    %28 = vector.load %arg2[%c1, %c0_9, %c0_10] : memref<3x8x4xf32, #tpu.memory_space<vmem>>, vector<1x8x4xf32>
    %29 = vector.shape_cast %28 : vector<1x8x4xf32> to vector<8x4xf32>
    %c2_i32_11 = arith.constant 2 : i32
    %30 = tpu.dynamic_rotate %0 by %c2_i32_11 dim 1 : vector<4x512xf32>, i32 -> vector<4x512xf32>
    %cst_12 = arith.constant 0.000000e+00 : f32
    %31 = vector.shape_cast %19 : vector<1x512xi1> to vector<1x512xi1>
    %32 = vector.broadcast %31 : vector<1x512xi1> to vector<4x512xi1>
    %33 = vector.broadcast %cst_12 : f32 to vector<4x512xf32>
    %34 = arith.select %32, %30, %33 : vector<4x512xi1>, vector<4x512xf32>
    %cst_13 = arith.constant dense<0.000000e+00> : vector<8x512xf32>
    %35 = tpu.matmul %29, %34, %cst_13 {dimension_numbers = #tpu.dot_dimension_numbers<[1], [0], [0], [1], [0, 0, 1, 1], [], []>} : vector<8x4xf32>, vector<4x512xf32>, vector<8x512xf32> -> vector<8x512xf32>
    %36 = arith.addf %27, %35 : vector<8x512xf32>
    %c2 = arith.constant 2 : index
    %c0_14 = arith.constant 0 : index
    %c0_15 = arith.constant 0 : index
    %37 = vector.load %arg2[%c2, %c0_14, %c0_15] : memref<3x8x4xf32, #tpu.memory_space<vmem>>, vector<1x8x4xf32>
    %38 = vector.shape_cast %37 : vector<1x8x4xf32> to vector<8x4xf32>
    %c4_i32_16 = arith.constant 4 : i32
    %39 = tpu.dynamic_rotate %0 by %c4_i32_16 dim 1 : vector<4x512xf32>, i32 -> vector<4x512xf32>
    %cst_17 = arith.constant 0.000000e+00 : f32
    %40 = vector.shape_cast %21 : vector<1x512xi1> to vector<1x512xi1>
    %41 = vector.broadcast %40 : vector<1x512xi1> to vector<4x512xi1>
    %42 = vector.broadcast %cst_17 : f32 to vector<4x512xf32>
    %43 = arith.select %41, %39, %42 : vector<4x512xi1>, vector<4x512xf32>
    %cst_18 = arith.constant dense<0.000000e+00> : vector<8x512xf32>
    %44 = tpu.matmul %38, %43, %cst_18 {dimension_numbers = #tpu.dot_dimension_numbers<[1], [0], [0], [1], [0, 0, 1, 1], [], []>} : vector<8x4xf32>, vector<4x512xf32>, vector<8x512xf32> -> vector<8x512xf32>
    %45 = arith.addf %36, %44 : vector<8x512xf32>
    %cst_19 = arith.constant 0.000000e+00 : f32
    %46 = vector.broadcast %cst_19 : f32 to vector<8x512xf32>
    %47 = arith.maximumf %45, %46 : vector<8x512xf32>
    %c0_20 = arith.constant 0 : index
    %c0_21 = arith.constant 0 : index
    %48 = vector.load %arg5[%c0_20, %c0_21] : memref<8x1xf32, #tpu.memory_space<vmem>>, vector<8x1xf32>
    %c0_22 = arith.constant 0 : index
    %c0_23 = arith.constant 0 : index
    %c0_24 = arith.constant 0 : index
    %49 = vector.load %arg4[%c0_22, %c0_23, %c0_24] : memref<3x8x8xf32, #tpu.memory_space<vmem>>, vector<1x8x8xf32>
    %50 = vector.shape_cast %49 : vector<1x8x8xf32> to vector<8x8xf32>
    %cst_25 = arith.constant dense<0.000000e+00> : vector<8x512xf32>
    %51 = tpu.matmul %50, %47, %cst_25 {dimension_numbers = #tpu.dot_dimension_numbers<[1], [0], [0], [1], [0, 0, 1, 1], [], []>} : vector<8x8xf32>, vector<8x512xf32>, vector<8x512xf32> -> vector<8x512xf32>
    %52 = vector.broadcast %48 : vector<8x1xf32> to vector<8x512xf32>
    %53 = arith.addf %52, %51 : vector<8x512xf32>
    %c1_26 = arith.constant 1 : index
    %c0_27 = arith.constant 0 : index
    %c0_28 = arith.constant 0 : index
    %54 = vector.load %arg4[%c1_26, %c0_27, %c0_28] : memref<3x8x8xf32, #tpu.memory_space<vmem>>, vector<1x8x8xf32>
    %55 = vector.shape_cast %54 : vector<1x8x8xf32> to vector<8x8xf32>
    %c2_i32_29 = arith.constant 2 : i32
    %56 = tpu.dynamic_rotate %47 by %c2_i32_29 dim 1 : vector<8x512xf32>, i32 -> vector<8x512xf32>
    %cst_30 = arith.constant 0.000000e+00 : f32
    %57 = vector.shape_cast %19 : vector<1x512xi1> to vector<1x512xi1>
    %58 = vector.broadcast %57 : vector<1x512xi1> to vector<8x512xi1>
    %59 = vector.broadcast %cst_30 : f32 to vector<8x512xf32>
    %60 = arith.select %58, %56, %59 : vector<8x512xi1>, vector<8x512xf32>
    %cst_31 = arith.constant dense<0.000000e+00> : vector<8x512xf32>
    %61 = tpu.matmul %55, %60, %cst_31 {dimension_numbers = #tpu.dot_dimension_numbers<[1], [0], [0], [1], [0, 0, 1, 1], [], []>} : vector<8x8xf32>, vector<8x512xf32>, vector<8x512xf32> -> vector<8x512xf32>
    %62 = arith.addf %53, %61 : vector<8x512xf32>
    %c2_32 = arith.constant 2 : index
    %c0_33 = arith.constant 0 : index
    %c0_34 = arith.constant 0 : index
    %63 = vector.load %arg4[%c2_32, %c0_33, %c0_34] : memref<3x8x8xf32, #tpu.memory_space<vmem>>, vector<1x8x8xf32>
    %64 = vector.shape_cast %63 : vector<1x8x8xf32> to vector<8x8xf32>
    %c4_i32_35 = arith.constant 4 : i32
    %65 = tpu.dynamic_rotate %47 by %c4_i32_35 dim 1 : vector<8x512xf32>, i32 -> vector<8x512xf32>
    %cst_36 = arith.constant 0.000000e+00 : f32
    %66 = vector.shape_cast %21 : vector<1x512xi1> to vector<1x512xi1>
    %67 = vector.broadcast %66 : vector<1x512xi1> to vector<8x512xi1>
    %68 = vector.broadcast %cst_36 : f32 to vector<8x512xf32>
    %69 = arith.select %67, %65, %68 : vector<8x512xi1>, vector<8x512xf32>
    %cst_37 = arith.constant dense<0.000000e+00> : vector<8x512xf32>
    %70 = tpu.matmul %64, %69, %cst_37 {dimension_numbers = #tpu.dot_dimension_numbers<[1], [0], [0], [1], [0, 0, 1, 1], [], []>} : vector<8x8xf32>, vector<8x512xf32>, vector<8x512xf32> -> vector<8x512xf32>
    %71 = arith.addf %62, %70 : vector<8x512xf32>
    %cst_38 = arith.constant 0.000000e+00 : f32
    %72 = vector.broadcast %cst_38 : f32 to vector<8x512xf32>
    %73 = arith.maximumf %71, %72 : vector<8x512xf32>
    %c0_39 = arith.constant 0 : index
    %c0_40 = arith.constant 0 : index
    %74 = vector.load %arg6[%c0_39, %c0_40] : memref<8x4xf32, #tpu.memory_space<vmem>>, vector<8x4xf32>
    %cst_41 = arith.constant dense<0.000000e+00> : vector<8x512xf32>
    %75 = tpu.matmul %74, %0, %cst_41 {dimension_numbers = #tpu.dot_dimension_numbers<[1], [0], [0], [1], [0, 0, 1, 1], [], []>} : vector<8x4xf32>, vector<4x512xf32>, vector<8x512xf32> -> vector<8x512xf32>
    %c0_42 = arith.constant 0 : index
    %c0_43 = arith.constant 0 : index
    %76 = vector.load %arg7[%c0_42, %c0_43] : memref<8x1xf32, #tpu.memory_space<vmem>>, vector<8x1xf32>
    %77 = vector.broadcast %76 : vector<8x1xf32> to vector<8x512xf32>
    %78 = arith.addf %75, %77 : vector<8x512xf32>
    %79 = arith.addf %73, %78 : vector<8x512xf32>
    %cst_44 = arith.constant 0.000000e+00 : f32
    %80 = vector.broadcast %cst_44 : f32 to vector<8x512xf32>
    %81 = arith.maximumf %79, %80 : vector<8x512xf32>
    %c0_45 = arith.constant 0 : index
    %c0_46 = arith.constant 0 : index
    %82 = vector.load %arg8[%c0_45, %c0_46] : memref<8x512xf32, #tpu.memory_space<vmem>>, vector<8x512xf32>
    tpu.vector_store %arg8[%c0_45, %c0_46], %81 {strides = array<i32>} : memref<8x512xf32, #tpu.memory_space<vmem>>, vector<8x512xf32>,
    return
  }
  func.func @transform_0(%arg0: i32) -> (i32, i32) {
    %c0_i32 = arith.constant 0 : i32
    %c0_i32_0 = arith.constant 0 : i32
    return %c0_i32, %arg0 : i32, i32
  }
  func.func @transform_1(%arg0: i32) -> (i32, i32, i32) {
    %c0_i32 = arith.constant 0 : i32
    %c0_i32_0 = arith.constant 0 : i32
    %c0_i32_1 = arith.constant 0 : i32
    %c0_i32_2 = arith.constant 0 : i32
    return %c0_i32, %c0_i32_0, %c0_i32_1 : i32, i32, i32
  }
  func.func @transform_2(%arg0: i32) -> (i32, i32) {
    %c0_i32 = arith.constant 0 : i32
    %c0_i32_0 = arith.constant 0 : i32
    %c0_i32_1 = arith.constant 0 : i32
    return %c0_i32, %c0_i32_0 : i32, i32
  }
  func.func @transform_3(%arg0: i32) -> (i32, i32, i32) {
    %c0_i32 = arith.constant 0 : i32
    %c0_i32_0 = arith.constant 0 : i32
    %c0_i32_1 = arith.constant 0 : i32
    %c0_i32_2 = arith.constant 0 : i32
    return %c0_i32, %c0_i32_0, %c0_i32_1 : i32, i32, i32
  }
  func.func @transform_4(%arg0: i32) -> (i32, i32) {
    %c0_i32 = arith.constant 0 : i32
    %c0_i32_0 = arith.constant 0 : i32
    %c0_i32_1 = arith.constant 0 : i32
    return %c0_i32, %c0_i32_0 : i32, i32
  }
  func.func @transform_5(%arg0: i32) -> (i32, i32) {
    %c0_i32 = arith.constant 0 : i32
    %c0_i32_0 = arith.constant 0 : i32
    %c0_i32_1 = arith.constant 0 : i32
    return %c0_i32, %c0_i32_0 : i32, i32
  }
  func.func @transform_6(%arg0: i32) -> (i32, i32) {
    %c0_i32 = arith.constant 0 : i32
    %c0_i32_0 = arith.constant 0 : i32
    %c0_i32_1 = arith.constant 0 : i32
    return %c0_i32, %c0_i32_0 : i32, i32
  }
  func.func @transform_7(%arg0: i32) -> (i32, i32) {
    %c0_i32 = arith.constant 0 : i32
    %c0_i32_0 = arith.constant 0 : i32
    return %c0_i32, %arg0 : i32, i32
  }
}

module attributes {stable_mosaic.version = 11 : i64} {
  func.func @temporal_block_kernel(%arg0: i32, %arg1: memref<4x512xf32, #tpu.memory_space<vmem>>, %arg2: memref<3x8x4xf32, #tpu.memory_space<vmem>>, %arg3: memref<8x1xf32, #tpu.memory_space<vmem>>, %arg4: memref<3x8x8xf32, #tpu.memory_space<vmem>>, %arg5: memref<8x1xf32, #tpu.memory_space<vmem>>, %arg6: memref<8x4xf32, #tpu.memory_space<vmem>>, %arg7: memref<8x1xf32, #tpu.memory_space<vmem>>, %arg8: memref<8x512xf32, #tpu.memory_space<vmem>>) attributes {dimension_semantics = [#tpu.dimension_semantics<parallel>], iteration_bounds = array<i64: 2>, scalar_prefetch = 0 : i64, scratch_operands = 0 : i64, tpu.core_type = #tpu.core_type<tc>, window_params = [{transform_indices = @transform_0, window_bounds = array<i64: 4, 512>}, {pipeline_mode = #tpu.pipeline_mode<synchronous>, transform_indices = @transform_1, window_bounds = array<i64: 3, 8, 4>}, {pipeline_mode = #tpu.pipeline_mode<synchronous>, transform_indices = @transform_2, window_bounds = array<i64: 8, 1>}, {pipeline_mode = #tpu.pipeline_mode<synchronous>, transform_indices = @transform_3, window_bounds = array<i64: 3, 8, 8>}, {pipeline_mode = #tpu.pipeline_mode<synchronous>, transform_indices = @transform_4, window_bounds = array<i64: 8, 1>}, {pipeline_mode = #tpu.pipeline_mode<synchronous>, transform_indices = @transform_5, window_bounds = array<i64: 8, 4>}, {pipeline_mode = #tpu.pipeline_mode<synchronous>, transform_indices = @transform_6, window_bounds = array<i64: 8, 1>}, {transform_indices = @transform_7, window_bounds = array<i64: 8, 512>}]} {
    %c0 = arith.constant 0 : index
    %c0_0 = arith.constant 0 : index
    %0 = vector.load %arg1[%c0, %c0_0] : memref<4x512xf32, #tpu.memory_space<vmem>>, vector<4x512xf32>
    %1 = tpu.iota {dimensions = array<i32: 1>} : vector<1x512xi32>
    %c128_i32 = arith.constant 128 : i32
    %c0_i32 = arith.constant 0 : i32
    %2 = arith.cmpi eq, %c128_i32, %c0_i32 : i32
    %c1_i32 = arith.constant 1 : i32
    %3 = arith.select %2, %c1_i32, %c128_i32 : i32
    %4 = vector.broadcast %3 : i32 to vector<1x512xi32>
    %5 = arith.remsi %1, %4 : vector<1x512xi32>
    %c0_i32_1 = arith.constant 0 : i32
    %6 = vector.broadcast %c0_i32_1 : i32 to vector<1x512xi32>
    %7 = arith.cmpi ne, %5, %6 : vector<1x512xi32>
    %c0_i32_2 = arith.constant 0 : i32
    %8 = vector.broadcast %c0_i32_2 : i32 to vector<1x512xi32>
    %9 = arith.cmpi slt, %5, %8 : vector<1x512xi32>
    %c0_i32_3 = arith.constant 0 : i32
    %10 = arith.cmpi slt, %3, %c0_i32_3 : i32
    %11 = vector.broadcast %10 : i1 to vector<1x512xi1>
    %12 = vector.broadcast %11 : vector<1x512xi1> to vector<1x512xi1>
    %13 = arith.xori %9, %12 : vector<1x512xi1>
    %14 = arith.andi %13, %7 : vector<1x512xi1>
    %15 = vector.broadcast %3 : i32 to vector<1x512xi32>
    %16 = arith.addi %5, %15 : vector<1x512xi32>
    %17 = arith.select %14, %16, %5 : vector<1x512xi1>, vector<1x512xi32>
    %c2_i32 = arith.constant 2 : i32
    %18 = vector.broadcast %c2_i32 : i32 to vector<1x512xi32>
    %19 = arith.cmpi sge, %17, %18 : vector<1x512xi32>
    %c4_i32 = arith.constant 4 : i32
    %20 = vector.broadcast %c4_i32 : i32 to vector<1x512xi32>
    %21 = arith.cmpi sge, %17, %20 : vector<1x512xi32>
    %c0_4 = arith.constant 0 : index
    %c0_5 = arith.constant 0 : index
    %22 = vector.load %arg3[%c0_4, %c0_5] : memref<8x1xf32, #tpu.memory_space<vmem>>, vector<8x1xf32>
    %c0_6 = arith.constant 0 : index
    %c0_7 = arith.constant 0 : index
    %c0_8 = arith.constant 0 : index
    %23 = vector.load %arg2[%c0_6, %c0_7, %c0_8] : memref<3x8x4xf32, #tpu.memory_space<vmem>>, vector<1x8x4xf32>
    %24 = vector.shape_cast %23 : vector<1x8x4xf32> to vector<8x4xf32>
    %cst = arith.constant dense<0.000000e+00> : vector<8x512xf32>
    %25 = tpu.matmul %24, %0, %cst {dimension_numbers = #tpu.dot_dimension_numbers<[1], [0], [0], [1], [0, 0, 1, 1], [], []>} : vector<8x4xf32>, vector<4x512xf32>, vector<8x512xf32> -> vector<8x512xf32>
    %26 = vector.broadcast %22 : vector<8x1xf32> to vector<8x512xf32>
    %27 = arith.addf %26, %25 : vector<8x512xf32>
    %c1 = arith.constant 1 : index
    %c0_9 = arith.constant 0 : index
    %c0_10 = arith.constant 0 : index
    %28 = vector.load %arg2[%c1, %c0_9, %c0_10] : memref<3x8x4xf32, #tpu.memory_space<vmem>>, vector<1x8x4xf32>
    %29 = vector.shape_cast %28 : vector<1x8x4xf32> to vector<8x4xf32>
    %c2_i32_11 = arith.constant 2 : i32
    %30 = tpu.dynamic_rotate %0 by %c2_i32_11 dim 1 : vector<4x512xf32>, i32 -> vector<4x512xf32>
    %cst_12 = arith.constant 0.000000e+00 : f32
    %31 = vector.shape_cast %19 : vector<1x512xi1> to vector<1x512xi1>
    %32 = vector.broadcast %31 : vector<1x512xi1> to vector<4x512xi1>
    %33 = vector.broadcast %cst_12 : f32 to vector<4x512xf32>
    %34 = arith.select %32, %30, %33 : vector<4x512xi1>, vector<4x512xf32>
    %cst_13 = arith.constant dense<0.000000e+00> : vector<8x512xf32>
    %35 = tpu.matmul %29, %34, %cst_13 {dimension_numbers = #tpu.dot_dimension_numbers<[1], [0], [0], [1], [0, 0, 1, 1], [], []>} : vector<8x4xf32>, vector<4x512xf32>, vector<8x512xf32> -> vector<8x512xf32>
    %36 = arith.addf %27, %35 : vector<8x512xf32>
    %c2 = arith.constant 2 : index
    %c0_14 = arith.constant 0 : index
    %c0_15 = arith.constant 0 : index
    %37 = vector.load %arg2[%c2, %c0_14, %c0_15] : memref<3x8x4xf32, #tpu.memory_space<vmem>>, vector<1x8x4xf32>
    %38 = vector.shape_cast %37 : vector<1x8x4xf32> to vector<8x4xf32>
    %c4_i32_16 = arith.constant 4 : i32
    %39 = tpu.dynamic_rotate %0 by %c4_i32_16 dim 1 : vector<4x512xf32>, i32 -> vector<4x512xf32>
    %cst_17 = arith.constant 0.000000e+00 : f32
    %40 = vector.shape_cast %21 : vector<1x512xi1> to vector<1x512xi1>
    %41 = vector.broadcast %40 : vector<1x512xi1> to vector<4x512xi1>
    %42 = vector.broadcast %cst_17 : f32 to vector<4x512xf32>
    %43 = arith.select %41, %39, %42 : vector<4x512xi1>, vector<4x512xf32>
    %cst_18 = arith.constant dense<0.000000e+00> : vector<8x512xf32>
    %44 = tpu.matmul %38, %43, %cst_18 {dimension_numbers = #tpu.dot_dimension_numbers<[1], [0], [0], [1], [0, 0, 1, 1], [], []>} : vector<8x4xf32>, vector<4x512xf32>, vector<8x512xf32> -> vector<8x512xf32>
    %45 = arith.addf %36, %44 : vector<8x512xf32>
    %cst_19 = arith.constant 0.000000e+00 : f32
    %46 = vector.broadcast %cst_19 : f32 to vector<8x512xf32>
    %47 = arith.maximumf %45, %46 : vector<8x512xf32>
    %c0_20 = arith.constant 0 : index
    %c0_21 = arith.constant 0 : index
    %48 = vector.load %arg5[%c0_20, %c0_21] : memref<8x1xf32, #tpu.memory_space<vmem>>, vector<8x1xf32>
    %c0_22 = arith.constant 0 : index
    %c0_23 = arith.constant 0 : index
    %c0_24 = arith.constant 0 : index
    %49 = vector.load %arg4[%c0_22, %c0_23, %c0_24] : memref<3x8x8xf32, #tpu.memory_space<vmem>>, vector<1x8x8xf32>
    %50 = vector.shape_cast %49 : vector<1x8x8xf32> to vector<8x8xf32>
    %cst_25 = arith.constant dense<0.000000e+00> : vector<8x512xf32>
    %51 = tpu.matmul %50, %47, %cst_25 {dimension_numbers = #tpu.dot_dimension_numbers<[1], [0], [0], [1], [0, 0, 1, 1], [], []>} : vector<8x8xf32>, vector<8x512xf32>, vector<8x512xf32> -> vector<8x512xf32>
    %52 = vector.broadcast %48 : vector<8x1xf32> to vector<8x512xf32>
    %53 = arith.addf %52, %51 : vector<8x512xf32>
    %c1_26 = arith.constant 1 : index
    %c0_27 = arith.constant 0 : index
    %c0_28 = arith.constant 0 : index
    %54 = vector.load %arg4[%c1_26, %c0_27, %c0_28] : memref<3x8x8xf32, #tpu.memory_space<vmem>>, vector<1x8x8xf32>
    %55 = vector.shape_cast %54 : vector<1x8x8xf32> to vector<8x8xf32>
    %c2_i32_29 = arith.constant 2 : i32
    %56 = tpu.dynamic_rotate %47 by %c2_i32_29 dim 1 : vector<8x512xf32>, i32 -> vector<8x512xf32>
    %cst_30 = arith.constant 0.000000e+00 : f32
    %57 = vector.shape_cast %19 : vector<1x512xi1> to vector<1x512xi1>
    %58 = vector.broadcast %57 : vector<1x512xi1> to vector<8x512xi1>
    %59 = vector.broadcast %cst_30 : f32 to vector<8x512xf32>
    %60 = arith.select %58, %56, %59 : vector<8x512xi1>, vector<8x512xf32>
    %cst_31 = arith.constant dense<0.000000e+00> : vector<8x512xf32>
    %61 = tpu.matmul %55, %60, %cst_31 {dimension_numbers = #tpu.dot_dimension_numbers<[1], [0], [0], [1], [0, 0, 1, 1], [], []>} : vector<8x8xf32>, vector<8x512xf32>, vector<8x512xf32> -> vector<8x512xf32>
    %62 = arith.addf %53, %61 : vector<8x512xf32>
    %c2_32 = arith.constant 2 : index
    %c0_33 = arith.constant 0 : index
    %c0_34 = arith.constant 0 : index
    %63 = vector.load %arg4[%c2_32, %c0_33, %c0_34] : memref<3x8x8xf32, #tpu.memory_space<vmem>>, vector<1x8x8xf32>
    %64 = vector.shape_cast %63 : vector<1x8x8xf32> to vector<8x8xf32>
    %c4_i32_35 = arith.constant 4 : i32
    %65 = tpu.dynamic_rotate %47 by %c4_i32_35 dim 1 : vector<8x512xf32>, i32 -> vector<8x512xf32>
    %cst_36 = arith.constant 0.000000e+00 : f32
    %66 = vector.shape_cast %21 : vector<1x512xi1> to vector<1x512xi1>
    %67 = vector.broadcast %66 : vector<1x512xi1> to vector<8x512xi1>
    %68 = vector.broadcast %cst_36 : f32 to vector<8x512xf32>
    %69 = arith.select %67, %65, %68 : vector<8x512xi1>, vector<8x512xf32>
    %cst_37 = arith.constant dense<0.000000e+00> : vector<8x512xf32>
    %70 = tpu.matmul %64, %69, %cst_37 {dimension_numbers = #tpu.dot_dimension_numbers<[1], [0], [0], [1], [0, 0, 1, 1], [], []>} : vector<8x8xf32>, vector<8x512xf32>, vector<8x512xf32> -> vector<8x512xf32>
    %71 = arith.addf %62, %70 : vector<8x512xf32>
    %cst_38 = arith.constant 0.000000e+00 : f32
    %72 = vector.broadcast %cst_38 : f32 to vector<8x512xf32>
    %73 = arith.maximumf %71, %72 : vector<8x512xf32>
    %c0_39 = arith.constant 0 : index
    %c0_40 = arith.constant 0 : index
    %74 = vector.load %arg6[%c0_39, %c0_40] : memref<8x4xf32, #tpu.memory_space<vmem>>, vector<8x4xf32>
    %cst_41 = arith.constant dense<0.000000e+00> : vector<8x512xf32>
    %75 = tpu.matmul %74, %0, %cst_41 {dimension_numbers = #tpu.dot_dimension_numbers<[1], [0], [0], [1], [0, 0, 1, 1], [], []>} : vector<8x4xf32>, vector<4x512xf32>, vector<8x512xf32> -> vector<8x512xf32>
    %c0_42 = arith.constant 0 : index
    %c0_43 = arith.constant 0 : index
    %76 = vector.load %arg7[%c0_42, %c0_43] : memref<8x1xf32, #tpu.memory_space<vmem>>, vector<8x1xf32>
    %77 = vector.broadcast %76 : vector<8x1xf32> to vector<8x512xf32>
    %78 = arith.addf %75, %77 : vector<8x512xf32>
    %79 = arith.addf %73, %78 : vector<8x512xf32>
    %cst_44 = arith.constant 0.000000e+00 : f32
    %80 = vector.broadcast %cst_44 : f32 to vector<8x512xf32>
    %81 = arith.maximumf %79, %80 : vector<8x512xf32>
    %c0_45 = arith.constant 0 : index
    %c0_46 = arith.constant 0 : index
    %82 = vector.load %arg8[%c0_45, %c0_46] : memref<8x512xf32, #tpu.memory_space<vmem>>, vector<8x512xf32>
    tpu.vector_store %arg8[%c0_45, %c0_46], %81 {strides = array<i32>} : memref<8x512xf32, #tpu.memory_space<vmem>>, vector<8x512xf32>,
    return
  }
  func.func @transform_0(%arg0: i32) -> (i32, i32) {
    %c0_i32 = arith.constant 0 : i32
    %c0_i32_0 = arith.constant 0 : i32
    return %c0_i32, %arg0 : i32, i32
  }
  func.func @transform_1(%arg0: i32) -> (i32, i32, i32) {
    %c0_i32 = arith.constant 0 : i32
    %c0_i32_0 = arith.constant 0 : i32
    %c0_i32_1 = arith.constant 0 : i32
    %c0_i32_2 = arith.constant 0 : i32
    return %c0_i32, %c0_i32_0, %c0_i32_1 : i32, i32, i32
  }
  func.func @transform_2(%arg0: i32) -> (i32, i32) {
    %c0_i32 = arith.constant 0 : i32
    %c0_i32_0 = arith.constant 0 : i32
    %c0_i32_1 = arith.constant 0 : i32
    return %c0_i32, %c0_i32_0 : i32, i32
  }
  func.func @transform_3(%arg0: i32) -> (i32, i32, i32) {
    %c0_i32 = arith.constant 0 : i32
    %c0_i32_0 = arith.constant 0 : i32
    %c0_i32_1 = arith.constant 0 : i32
    %c0_i32_2 = arith.constant 0 : i32
    return %c0_i32, %c0_i32_0, %c0_i32_1 : i32, i32, i32
  }
  func.func @transform_4(%arg0: i32) -> (i32, i32) {
    %c0_i32 = arith.constant 0 : i32
    %c0_i32_0 = arith.constant 0 : i32
    %c0_i32_1 = arith.constant 0 : i32
    return %c0_i32, %c0_i32_0 : i32, i32
  }
  func.func @transform_5(%arg0: i32) -> (i32, i32) {
    %c0_i32 = arith.constant 0 : i32
    %c0_i32_0 = arith.constant 0 : i32
    %c0_i32_1 = arith.constant 0 : i32
    return %c0_i32, %c0_i32_0 : i32, i32
  }
  func.func @transform_6(%arg0: i32) -> (i32, i32) {
    %c0_i32 = arith.constant 0 : i32
    %c0_i32_0 = arith.constant 0 : i32
    %c0_i32_1 = arith.constant 0 : i32
    return %c0_i32, %c0_i32_0 : i32, i32
  }
  func.func @transform_7(%arg0: i32) -> (i32, i32) {
    %c0_i32 = arith.constant 0 : i32
    %c0_i32_0 = arith.constant 0 : i32
    return %c0_i32, %arg0 : i32, i32
  }
}

</mosaic_0001>

<bundles_post_ra>
// kernel: tpu_custom_call.1
= control target key start
LH: loop header
LB: loop body
LE: loop exit
PB: predicated region body
PF: predicated region fallthrough
CT: control target
= control target key end

     0   :  { %12 = vsyncpa [#allocation3], 0  ;;  %s2837_s0 = inlined_call_operand.hbm [shape: f32[4,1024], index: 0, kind: input, shape index: {}]   ;;  %s2838_s1 = inlined_call_operand.hbm [shape: f32[3,8,4], index: 1, kind: input, shape index: {}]   ;;  %s2839_s2 = inlined_call_operand.hbm [shape: f32[8,1], index: 2, kind: input, shape index: {}]   ;;  %s2840_s3 = inlined_call_operand.hbm [shape: f32[3,8,8], index: 3, kind: input, shape index: {}]   ;;  %s2841_s4 = inlined_call_operand.hbm [shape: f32[8,1], index: 4, kind: input, shape index: {}]   ;;  %s2842_s5 = inlined_call_operand.hbm [shape: f32[8,4], index: 5, kind: input, shape index: {}]   ;;  %s2843_s6 = inlined_call_operand.hbm [shape: f32[8,1], index: 6, kind: input, shape index: {}]   ;;  %s2844_s7 = inlined_call_operand.hbm [shape: f32[8,1024], index: 7, kind: output, shape index: {}]  }
   0x1   :  { %14 = vsyncpa [#allocation3 + $0x1], 0 }
   0x2   :  { %15 = vsyncpa [#allocation6], 0 }
   0x3   :  { %16 = vsyncpa [#allocation9], 0 }
   0x4   :  { %17 = vsyncpa [#allocation12], 0 }
   0x5   :  { %18 = vsyncpa [#allocation4], 0 }
   0x6   :  { %20 = vsyncpa [#allocation4 + $0x1], 0  ;;  %s2331_s24 = smov 0   ;;  %s2333_s25 = smov 0  }
   0x7   :  { %s2335_s26 = smov 0   ;;  %s2337_s27 = smov 0  }
   0x8 LB: > { %s2277_s28 = smov [#allocation5]   ;;  %s2352_s30 = sadd.s32 4294967295, %s2275_s27   ;;  %s2275_s27 = sphi %s2337_s27, %s2882_s27   ;;  %s2271_s26 = sphi %s2335_s26, %s2881_s26   ;;  %s2267_s25 = sphi %s2333_s25, %s2880_s25   ;;  %s2263_s24 = sphi %s2331_s24, %s2879_s24  }
   0x9   : > { %s221_s29 = sshll.u32 %s2277_s28, 4  ;;  %p1793_p0 = scmp.ge.s32.totalorder %s2275_s27, 1  ;;  %s2357_s29 = int_to_ptr.vmem [resolvable:$true] %s221_s29 }
   0xa   : > { %p2845_p1 = scmp.eq.s32.totalorder %s2352_s30, 0  ;;  %p209_p2 = scmp.lt.s32.totalorder %s2275_s27, 3 }
   0xb   : > { %s2278_s9 = smov [#allocation8]   ;;  %s2279_s12 = smov [#allocation11]  }
   0xc   : > { %p2359_p3 = pnand %p1793_p0, %p209_p2  ;;  %s245_s10 = sshll.u32 %s2278_s9, 4  ;;  %s2372_s10 = int_to_ptr.vmem [resolvable:$true] %s245_s10 }
   0xd   : > { %s270_s13 = sshll.u32 %s2279_s12, 4  ;;  %s1999_s16 = scalar_lea.hbm %s2838_s1, 384  ;;  %s2374_s13 = int_to_ptr.vmem [resolvable:$true] %s270_s13 }
   0xe   : > { %s2848_s8 = scalar_select %p2359_p3, 1, 0 }
   0xf   : > { %p1910_p5 = pneg %p2359_p3  ;;  %p2000_p7 = scmp.ne.s32.totalorder %s2838_s1, %s1999_s16 }
  0x10   : > { %p2006_p11 = scmp.lt.u32.totalorder %s1999_s16, %s2838_s1 }
  0x11   : > { %p2368_p6 = pnand %p1910_p5, %p2845_p1 }
  0x13   : > { %p2384_p8 = pneg %p2368_p6 }
  0x15   : > { %p2002_p9 = pnand %p2384_p8, %p2000_p7 }
  0x17   : > { %p2003_p10 = pneg %p2002_p9 }
  0x19   : > { %p2008_p12 = pnand %p2006_p11, %p2003_p10 }
  0x1b   : > { %2011 = shalt.err (!%p2008_p12)
}
  0x1c   : > { %s2012_s22 = scalar_lea.vmem %s2357_s29, 384  ;;  %p2020_p5 = scmp.lt.s32.totalorder %s2357_s29, %s2357_s29 }
  0x1d   : > { %p2013_p13 = scmp.ne.s32.totalorder %s2357_s29, %s2012_s22  ;;  %p2021_p4 = scmp.lt.s32.totalorder %s2012_s22, %s2012_s22 }
  0x1f   : > { %p2015_p0 = pnand %p2013_p13, %p2384_p8  ;;  %p2022_p7 = por %p2021_p4, %p2020_p5 }
  0x21   : > { %p2016_p2 = pneg %p2015_p0 }
  0x23   : > { %p2023_p9 = pnand %p2022_p7, %p2016_p2 }
  0x25   : > { %2026 = shalt.err (!%p2023_p9)
}
  0x26   : > { %s2280_s23 = smov 128   ;;  %s2281_s28 = smov 8  }
  0x27   : > { %1913 = dma.hbm_to_vmem [thread:$0]  (!%p2368_p6), %s2838_s1, 384, %s2357_s29, [#allocation6], %s2280_s23, %s2280_s23, %s2281_s28  }
  0x28   : > { %s2027_s16 = scalar_lea.hbm %s2840_s3, 384 }
  0x29   : > { %p2028_p4 = scmp.ne.s32.totalorder %s2840_s3, %s2027_s16  ;;  %p2034_p12 = scmp.lt.u32.totalorder %s2027_s16, %s2840_s3 }
  0x2b   : > { %p2030_p10 = pnand %p2028_p4, %p2384_p8 }
  0x2d   : > { %p2031_p11 = pneg %p2030_p10 }
  0x2f   : > { %p2036_p13 = pnand %p2034_p12, %p2031_p11 }
  0x31   : > { %2039 = shalt.err (!%p2036_p13)
}
  0x32   : > { %s2040_s29 = scalar_lea.vmem %s2372_s10, 384  ;;  %p2048_p7 = scmp.lt.s32.totalorder %s2372_s10, %s2372_s10 }
  0x33   : > { %p2041_p0 = scmp.ne.s32.totalorder %s2372_s10, %s2040_s29  ;;  %p2049_p9 = scmp.lt.s32.totalorder %s2040_s29, %s2040_s29 }
  0x35   : > { %p2043_p2 = pnand %p2041_p0, %p2384_p8  ;;  %p2050_p4 = por %p2049_p9, %p2048_p7 }
  0x37   : > { %p2044_p5 = pneg %p2043_p2 }
  0x39   : > { %p2051_p10 = pnand %p2050_p4, %p2044_p5 }
  0x3b   : > { %2054 = shalt.err (!%p2051_p10)
}
  0x3c   : > { %1919 = dma.hbm_to_vmem [thread:$0]  (!%p2368_p6), %s2840_s3, 384, %s2372_s10, [#allocation9], %s2280_s23, %s2280_s23, %s2281_s28  }
  0x3d   : > { %s2055_s15 = scalar_lea.hbm %s2842_s5, 128 }
  0x3e   : > { %p2056_p11 = scmp.ne.s32.totalorder %s2842_s5, %s2055_s15  ;;  %p2062_p0 = scmp.lt.u32.totalorder %s2055_s15, %s2842_s5 }
  0x40   : > { %p2058_p12 = pnand %p2056_p11, %p2384_p8 }
  0x42   : > { %p2059_p13 = pneg %p2058_p12 }
  0x44   : > { %p2064_p2 = pnand %p2062_p0, %p2059_p13 }
  0x46   : > { %2067 = shalt.err (!%p2064_p2)
}
  0x47   : > { %s2068_s10 = scalar_lea.vmem %s2374_s13, 128  ;;  %p2076_p4 = scmp.lt.s32.totalorder %s2374_s13, %s2374_s13 }
  0x48   : > { %p2069_p5 = scmp.ne.s32.totalorder %s2374_s13, %s2068_s10  ;;  %p2077_p10 = scmp.lt.s32.totalorder %s2068_s10, %s2068_s10 }
  0x4a   : > { %p2071_p7 = pnand %p2069_p5, %p2384_p8  ;;  %p2078_p11 = por %p2077_p10, %p2076_p4 }
  0x4c   : > { %p2072_p9 = pneg %p2071_p7 }
  0x4e   : > { %p2079_p12 = pnand %p2078_p11, %p2072_p9 }
  0x50   : > { %2082 = shalt.err (!%p2079_p12)
}
  0x51   : > { %1925 = dma.hbm_to_vmem [thread:$0]  (!%p2368_p6), %s2842_s5, 128, %s2374_s13, [#allocation12]  }
  0x52   : > { %s2282_s21 = smov [#allocation7]   ;;  %s2283_s22 = smov [#allocation10]  }
  0x53   : > { %s235_s29 = sshll.u32 %s2282_s21, 4  ;;  %s259_s9 = sshll.u32 %s2283_s22, 4  ;;  %s236_s29 = int_to_ptr.vmem [resolvable:$true] %s235_s29  ;;  %s260_s9 = int_to_ptr.vmem [resolvable:$true] %s259_s9 }
  0x54   : > { %s2083_s15 = scalar_lea.hbm %s2839_s2, 128 }
  0x55   : > { %p2084_p13 = scmp.ne.s32.totalorder %s2839_s2, %s2083_s15  ;;  %p2090_p5 = scmp.lt.u32.totalorder %s2083_s15, %s2839_s2 }
  0x57   : > { %p2086_p0 = pnand %p2084_p13, %p2384_p8 }
  0x59   : > { %p2087_p2 = pneg %p2086_p0 }
  0x5b   : > { %p2092_p7 = pnand %p2090_p5, %p2087_p2 }
  0x5d   : > { %2095 = shalt.err (!%p2092_p7)
}
  0x5e   : > { %s2096_s13 = scalar_lea.vmem %s236_s29, 128  ;;  %p2104_p11 = scmp.lt.s32.totalorder %s236_s29, %s236_s29 }
  0x5f   : > { %p2097_p9 = scmp.ne.s32.totalorder %s236_s29, %s2096_s13  ;;  %p2105_p12 = scmp.lt.s32.totalorder %s2096_s13, %s2096_s13 }
  0x61   : > { %p2099_p4 = pnand %p2097_p9, %p2384_p8  ;;  %p2106_p1 = por %p2105_p12, %p2104_p11 }
  0x63   : > { %p2100_p10 = pneg %p2099_p4 }
  0x65   : > { %p2107_p3 = pnand %p2106_p1, %p2100_p10 }
  0x67   : > { %2110 = shalt.err (!%p2107_p3)
}
  0x68   : > { %1916 = dma.hbm_to_vmem [thread:$0]  (!%p2368_p6), %s2839_s2, 128, %s236_s29, [#allocation6]  }
  0x69   : > { %s2111_s22 = scalar_lea.hbm %s2841_s4, 128 }
  0x6a   : > { %p2112_p13 = scmp.ne.s32.totalorder %s2841_s4, %s2111_s22  ;;  %p2118_p3 = scmp.lt.u32.totalorder %s2111_s22, %s2841_s4 }
  0x6c   : > { %p2114_p0 = pnand %p2112_p13, %p2384_p8 }
  0x6e   : > { %p2115_p1 = pneg %p2114_p0 }
  0x70   : > { %p2120_p2 = pnand %p2118_p3, %p2115_p1 }
  0x72   : > { %2123 = shalt.err (!%p2120_p2)
}
  0x73   : > { %s2124_s17 = scalar_lea.vmem %s260_s9, 128  ;;  %p2132_p4 = scmp.lt.s32.totalorder %s260_s9, %s260_s9 }
  0x74   : > { %p2125_p5 = scmp.ne.s32.totalorder %s260_s9, %s2124_s17  ;;  %p2133_p10 = scmp.lt.s32.totalorder %s2124_s17, %s2124_s17 }
  0x76   : > { %p2127_p7 = pnand %p2125_p5, %p2384_p8  ;;  %p2134_p11 = por %p2133_p10, %p2132_p4 }
  0x78   : > { %p2128_p9 = pneg %p2127_p7 }
  0x7a   : > { %p2135_p12 = pnand %p2134_p11, %p2128_p9 }
  0x7c   : > { %2138 = shalt.err (!%p2135_p12)
}
  0x7d   : > { %1922 = dma.hbm_to_vmem [thread:$0]  (!%p2368_p6), %s2841_s4, 128, %s260_s9, [#allocation9]  }
  0x7e   : > { %s2284_s20 = smov [#allocation13]   ;;  %s2139_s28 = scalar_lea.hbm %s2843_s6, 128 }
  0x7f   : > { %s281_s13 = sshll.u32 %s2284_s20, 4  ;;  %p2140_p13 = scmp.ne.s32.totalorder %s2843_s6, %s2139_s28  ;;  %s282_s13 = int_to_ptr.vmem [resolvable:$true] %s281_s13 }
  0x80   : > { %p2146_p3 = scmp.lt.u32.totalorder %s2139_s28, %s2843_s6 }
  0x81   : > { %p2142_p0 = pnand %p2140_p13, %p2384_p8 }
  0x83   : > { %p2143_p1 = pneg %p2142_p0 }
  0x85   : > { %p2148_p2 = pnand %p2146_p3, %p2143_p1 }
  0x87   : > { %2151 = shalt.err (!%p2148_p2)
}
  0x88   : > { %s2152_s9 = scalar_lea.vmem %s282_s13, 128  ;;  %p2160_p4 = scmp.lt.s32.totalorder %s282_s13, %s282_s13 }
  0x89   : > { %p2153_p5 = scmp.ne.s32.totalorder %s282_s13, %s2152_s9  ;;  %p2161_p10 = scmp.lt.s32.totalorder %s2152_s9, %s2152_s9 }
  0x8b   : > { %p2155_p7 = pnand %p2153_p5, %p2384_p8  ;;  %p2162_p11 = por %p2161_p10, %p2160_p4 }
  0x8d   : > { %p2156_p9 = pneg %p2155_p7 }
  0x8f   : > { %p2163_p12 = pnand %p2162_p11, %p2156_p9 }
  0x91   : > { %2166 = shalt.err (!%p2163_p12)
}
  0x92   : > { %1928 = dma.hbm_to_vmem [thread:$0]  (!%p2368_p6), %s2843_s6, 128, %s282_s13, [#allocation12]  }
  0x93   : > { %s1792_s19 = sadd.s32 4294967294, %s2275_s27   ;;  %s2507_s11 = sadd.s32 1, %s2275_s27  }
  0x94   : > { %s30_s17 = ssub.s32 %s2275_s27, %s2507_s11  ;;  %s33_s29 = sadd.s32 1, %s2271_s26 }
  0x95   : > { %p31_p8 = scmp.eq.s32.totalorder %s30_s17, 0  ;;  %p40_p13 = scmp.ne.s32.totalorder %s2271_s26, %s2267_s25 }
  0x96   : > { %p41_p0 = scmp.eq.s32.totalorder %s2275_s27, 0  ;;  %p46_p1 = scmp.ne.s32.totalorder %s2267_s25, %s2263_s24 }
  0x97   : > { %s2518_s18 = scalar_select %p31_p8, %s2271_s26, %s33_s29  }
  0x98   : > { %p2520_p3 = por %p41_p0, %p40_p13  ;;  %p2852_p2 = scmp.eq.s32.totalorder %s2352_s30, 0 }
  0x99   : > { %p196_p5 = scmp.eq.s32.totalorder %s2352_s30, 1  ;;  %p202_p7 = scmp.eq.s32.totalorder %s1792_s19, 1 }
  0x9a   : > { %p2526_p6 = por %p2852_p2, %p46_p1  ;;  %p1943_p9 = scmp.lt.s32.totalorder %s2275_s27, 2 }
  0x9b   : > { %s292_s10 = sand.u32 1, %s2271_s26   ;;  %p2533_p4 = por %p196_p5, %p40_p13 }
  0x9c   : > { %p2537_p10 = por %p202_p7, %p46_p1  ;;  %s1801_s21 = sshll.u32 %s292_s10, 4 }
  0x9d   : > { %s2854_s23 = scalar_select %p2533_p4, 1, 0 }
  0x9e   : > { %s2855_s28 = scalar_select %p2537_p10, 1, 0 }
  0x9f   : > { %s1856_s22 = sshll.u32 %s2275_s27, 8  ;;  %s296_s15 = scalar_lea.vmem [#allocation2], %s1801_s21 }
  0xa0   : > { %s2545_s9 = scalar_lea.hbm %s2837_s0, %s1856_s22  ;;  %s304_s16 = sshll.u32 %s296_s15, 4  ;;  %s2547_s16 = int_to_ptr.vmem [resolvable:$true] %s304_s16 }
  0xa1   : > { %p2551_p11 = pnand %p1943_p9, %p2520_p3  ;;  %s293_s17 = scalar_lea.sflag [#allocation3], %s292_s10 }
  0xa2   : > { %s2167_s29 = scalar_lea.hbm %s2545_s9, 256  ;;  %s2172_s12 = scalar_lea.hbm %s2837_s0, 512 }
  0xa3   : > { %p2168_p12 = scmp.ne.s32.totalorder %s2545_s9, %s2167_s29  ;;  %p2169_p8 = pneg %p2551_p11 }
  0xa4   : > { %p2173_p1 = scmp.lt.u32.totalorder %s2545_s9, %s2837_s0  ;;  %p2174_p3 = scmp.lt.u32.totalorder %s2172_s12, %s2167_s29 }
  0xa5   : > { %p2170_p13 = pnand %p2169_p8, %p2168_p12  ;;  %p2176_p5 = scmp.lt.u32.totalorder %s2167_s29, %s2545_s9 }
  0xa6   : > { %p2175_p2 = por %p2174_p3, %p2173_p1 }
  0xa7   : > { %p2171_p0 = pneg %p2170_p13 }
  0xa8   : > { %p2177_p7 = por %p2176_p5, %p2175_p2 }
  0xaa   : > { %p2178_p9 = pnand %p2177_p7, %p2171_p0 }
  0xac   : > { %2181 = shalt.err (!%p2178_p9)
}
  0xad   : > { %s2182_s10 = scalar_lea.vmem %s2547_s16, 256  ;;  %s2285_s15 = smov [#allocation2]  }
  0xae   : > { %p2183_p12 = scmp.ne.s32.totalorder %s2547_s16, %s2182_s10  ;;  %s2187_s21 = sshll.u32 %s2285_s15, 4  ;;  %s2188_s21 = int_to_ptr.vmem [resolvable:$false] %s2187_s21 }
  0xaf   : > { %s2189_s22 = scalar_lea.vmem %s2188_s21, 512  ;;  %p2190_p4 = scmp.lt.s32.totalorder %s2547_s16, %s2188_s21 }
  0xb0   : > { %p2185_p13 = pnand %p2183_p12, %p2169_p8  ;;  %p2191_p1 = scmp.lt.s32.totalorder %s2189_s22, %s2182_s10 }
  0xb2   : > { %p2186_p10 = pneg %p2185_p13  ;;  %p2192_p3 = por %p2191_p1, %p2190_p4 }
  0xb4   : > { %p2193_p2 = pnand %p2192_p3, %p2186_p10 }
  0xb6   : > { %2196 = shalt.err (!%p2193_p2)
}
  0xb7   : > { %1932 = dma.hbm_to_vmem [thread:$0]  (!%p2551_p11), %s2545_s9, 256, %s2547_s16, %s293_s17  }
  0xb8   : > { %p2857_p0 = scmp.ne.s32.totalorder %s2848_s8, 0 }
  0xb9   : > { %s2583_s29 = sand.u32 (!%p2857_p0), 1, %s2267_s25  }
  0xba   : > { %313 = sbr.rel (%p2857_p0) target bundleno = 923 (0x39b), region = 48  ;;  %s1805_s12 = sshll.u32 (!%p2857_p0), %s2583_s29, 4 }
  0xbb   : > { %s316_s20 = scalar_lea.sflag (!%p2857_p0), [#allocation3], %s2583_s29  ;;  %s319_s14 = scalar_lea.vmem (!%p2857_p0), [#allocation2], %s1805_s12 }
  0xc1   : > { %2242 = dma.done.wait (%p2526_p6), %s316_s20, 256  }
  0xc2   : > { %2244 = vsyncadd (%p2526_p6), %s316_s20, 4294967040  ;;  %p2858_p4 = scmp.eq.s32.totalorder %s2352_s30, 0 }
  0xc4   : > { %2246 = dma.done.wait (%p2858_p4), [#allocation6], 512   ;;  %p2859_p10 = pmov %p2858_p4 }
  0xc5   : > { %p2860_p11 = pmov %p2858_p4 }
  0xc6   : > { %2248 = vsyncadd (%p2859_p10), [#allocation6], 4294966784 }
  0xc7   : > { %2250 = dma.done.wait (%p2860_p11), [#allocation9], 512   ;;  %p2861_p8 = pmov %p2858_p4 }
  0xc8   : > { %p2862_p5 = pmov %p2858_p4 }
  0xc9   : > { %2252 = vsyncadd (%p2861_p8), [#allocation9], 4294966784 }
  0xca   : > { %2254 = dma.done.wait (%p2862_p5), [#allocation12], 256   ;;  %p2863_p7 = pmov %p2858_p4 }
  0xcb   : > { %v2286_v0 = vmov 0.0   ;;  %v2605_v1 = vld [vmem:[%s319_s14 + $0x8] sm:$0xff]  ;;  %v2607_v2 = vld [vmem:[%s319_s14] sm:$0xff]  ;;  %vm449_vm0 = vcmask 1043456   ;;  %s2287_s8 = smov 2   ;;  %vm445_vm1 = vcmask 31744   ;;  %v378_v8 = vlaneseq }
  0xcc   : > { %2256 = vsyncadd (%p2863_p7), [#allocation12], 4294967040  ;;  %522 = vmatprep.mubr.f32.mxu0 %v2286_v0  ;;  %593 = vmatprep.mubr.f32.mxu1 %v2286_v0  ;;  %v2615_v3 = vcombine.high %v2605_v1, %v2605_v1  ;;  %v2619_v4 = vcombine.high %v2607_v2, %v2607_v2  ;;  %v440_v5 = vld [vmem:[#allocation5] sm:$0xff]  ;;  %v2288_v6 = vmov 0   ;;  %s2289_s13 = smov 4   ;;  %v439_v7 = vld [vmem:[#allocation7] sm:$0xff] }
  0xcd   : > { %617 = vrot.lane.b32.xlu1 %v2605_v1, %s2287_s8  ;;  %613 = vrot.lane.b32.xlu0 %v2607_v2, %s2287_s8  ;;  %v2645_v9 = vand.u32 127, %v378_v8  ;;  %v610_v31 = vld [vmem:[#allocation5 + $0x8] sm:$0xff]  ;;  %v800_v47 = vld [vmem:[#allocation5 + $0x10] sm:$0xff]  ;;  %v992_v61 = vld [vmem:[#allocation8] sm:$0xff]  ;;  %vm993_vm12 = vcmask 64512   ;;  %s1812_s9 = sshll.u32 %s2583_s29, 5 }
  0xce   : > { %1813 = vmatprep.subr.msk.mxu0 %vm449_vm0, %v2619_v4  ;;  %1816 = vmatprep.subr.msk.mxu1 %vm449_vm0, %v2615_v3  ;;  %v991_v62 = vld [vmem:[#allocation10] sm:$0xff]  ;;  %v1487_v63 = vld [vmem:[#allocation13] sm:$0xff]  ;;  %s1857_s16 = sshll.u32 %s2352_s30, 9  ;;  %s373_s19 = scalar_lea.vmem [#allocation14], %s1812_s9 }
  0xcf   : > { %1817 = vmatpush1.msk.msra.mxu1 %vm449_vm0, %v2605_v1  ;;  %1814 = vmatpush1.msk.msra.mxu0 %vm449_vm0, %v2607_v2  ;;  %v382_v10 = vadd.s32 384, %v2645_v9  ;;  %v380_v11 = vadd.s32 128, %v2645_v9  ;;  %v381_v12 = vadd.s32 256, %v2645_v9  ;;  %vm621_vm2 = vcmp.lt.s32.totalorder %v2645_v9, 2  ;;  %s1665_s17 = sshll.u32 %s373_s19, 4  ;;  %s2793_s21 = scalar_lea.hbm %s2844_s7, %s1857_s16  ;;  %s2795_s17 = int_to_ptr.vmem [resolvable:$true] %s1665_s17 }
  0xd0   : > { %1815 = vmatmul.mubr.msk.f32.vlgmr.msra.gmra.mrb[0].mxu0 %vm445_vm1, %v440_v5  ;;  %1818 = vmatmul.mubr.msk.f32.vlgmr.msra.gmra.mrb[0].mxu1 %vm445_vm1, %v440_v5  ;;  %vm431_vm3 = vcmp.ge.s32.totalorder %v2645_v9, 2  ;;  %vm809_vm7 = vcmp.lt.s32.totalorder %v2645_v9, 4  ;;  %vm435_vm9 = vcmp.ge.s32.totalorder %v2645_v9, 4  ;;  %s1651_s30 = scalar_lea.sflag [#allocation4], %s2583_s29  ;;  %s2197_s22 = scalar_lea.vmem %s2795_s17, 512 }
  0xd1   : > { %619 = vrot.lane.b32.xlu1 %v2615_v3, %s2287_s8  ;;  %615 = vrot.lane.b32.xlu0 %v2619_v4, %s2287_s8  ;;  %v408_v13 = vand.u32 127, %v382_v10  ;;  %v394_v14 = vand.u32 127, %v380_v11  ;;  %v401_v15 = vand.u32 127, %v381_v12  ;;  %v1149_v11 = vld [vmem:[#allocation8 + $0x8] sm:$0xff]  ;;  %p2198_p6 = scmp.ne.s32.totalorder %s2795_s17, %s2197_s22  ;;  %p2876_p9 = scmp.ne.s32.totalorder %s2854_s23, 0 }
  0xd2   : > { %788 = vmatprep.mubr.f32.mxu1 %v2286_v0  ;;  %717 = vmatprep.mubr.f32.mxu0 %v2286_v0  ;;  %s2290_s12 = smov [#allocation14]  }
  0xd3   : > { %1995 = vset.pattern.permute.xlu0 %v2288_v6  ;;  %1996 = vset.pattern.permute.xlu1 %v2288_v6  ;;  %vm2652_vm4 = vcmp.ge.s32.totalorder %v408_v13, 2  ;;  %vm2656_vm5 = vcmp.ge.s32.totalorder %v394_v14, 2  ;;  %vm2660_vm6 = vcmp.ge.s32.totalorder %v401_v15, 2  ;;  %vm2683_vm8 = vcmp.ge.s32.totalorder %v394_v14, 4  ;;  %p2199_p12 = pnand %p2198_p6, %p2876_p9  ;;  %s2201_s20 = sshll.u32 %s2290_s12, 4  ;;  %s2202_s20 = int_to_ptr.vmem [resolvable:$false] %s2201_s20 }
  0xd4   : > { %vm2698_vm10 = vcmp.ge.s32.totalorder %v401_v15, 4  ;;  %vm2702_vm11 = vcmp.ge.s32.totalorder %v408_v13, 4  ;;  %s2203_s14 = scalar_lea.vmem %s2202_s20, 1024  ;;  %p2204_p1 = scmp.lt.s32.totalorder %s2795_s17, %s2202_s20 }
  0xd5   : > { %803 = vrot.lane.b32.xlu1 %v2619_v4, %s2289_s13  ;;  %801 = vrot.lane.b32.xlu0 %v2607_v2, %s2289_s13  ;;  %p2200_p13 = pneg %p2199_p12  ;;  %p2205_p3 = scmp.lt.s32.totalorder %s2203_s14, %s2197_s22 }
  0xd7   : > { %p2206_p2 = por %p2205_p3, %p2204_p1 }
  0xd9   : > { %807 = vrot.lane.b32.xlu1 %v2615_v3, %s2289_s13  ;;  %805 = vrot.lane.b32.xlu0 %v2605_v1, %s2289_s13  ;;  %p2207_p0 = pnand %p2206_p2, %p2200_p13 }
  0xdd   : > { %602 = vperm.xlu0 %1995, %v439_v7  }
 0x13f   : > { %v618_v16 = vpop.permute.xlu1 %617  ;;  %v614_v17 = vpop.permute.xlu0 %613 }
 0x143   : > { %v620_v21 = vpop.permute.xlu1 %619  ;;  %v616_v22 = vpop.permute.xlu0 %615 }
 0x144   : > { %v622_v23 = vsel %vm621_vm2, %v618_v16, %v620_v21  ;;  %v625_v24 = vsel %vm621_vm2, %v620_v21, %v614_v17  ;;  %v623_v25 = vsel %vm621_vm2, %v616_v22, %v618_v16  ;;  %v624_v26 = vsel %vm621_vm2, %v614_v17, %v616_v22  ;;  %v1316_v21 = vld [vmem:[#allocation8 + $0x10] sm:$0xff] }
 0x145   : > { %v634_v27 = vsel %vm431_vm3, %v625_v24, 0.0  ;;  %v637_v28 = vsel %vm2652_vm4, %v622_v23, 0.0  ;;  %v635_v29 = vsel %vm2656_vm5, %v624_v26, 0.0  ;;  %v636_v30 = vsel %vm2660_vm6, %v623_v25, 0.0  ;;  %v1486_v24 = vld [vmem:[#allocation11] sm:$0xff] }
 0x146   : > { %1819 = vmatprep.subr.msk.mxu0 %vm449_vm0, %v635_v29  ;;  %1822 = vmatprep.subr.msk.mxu1 %vm449_vm0, %v637_v28 }
 0x147   : > { %v804_v33 = vpop.permute.xlu1 %803  ;;  %1823 = vmatpush1.msk.msra.mxu1 %vm449_vm0, %v636_v30  ;;  %v802_v34 = vpop.permute.xlu0 %801  ;;  %1820 = vmatpush1.msk.msra.mxu0 %vm449_vm0, %v634_v27 }
 0x148   : > { %v812_v35 = vsel %vm809_vm7, %v802_v34, %v804_v33  ;;  %1821 = vmatmul.mubr.msk.f32.vlgmr.msra.gmra.mrb[0].mxu0 %vm445_vm1, %v610_v31  ;;  %1824 = vmatmul.mubr.msk.f32.vlgmr.msra.gmra.mrb[0].mxu1 %vm445_vm1, %v610_v31 }
 0x149   : > { %v823_v36 = vsel %vm2683_vm8, %v812_v35, 0.0  ;;  %905 = vmatprep.mubr.f32.mxu0 %v2286_v0  ;;  %976 = vmatprep.mubr.f32.mxu1 %v2286_v0 }
 0x14a   : > { %1825 = vmatprep.subr.msk.mxu0 %vm449_vm0, %v823_v36 }
 0x14b   : > { %v808_v39 = vpop.permute.xlu1 %807  ;;  %v806_v40 = vpop.permute.xlu0 %805 }
 0x14c   : > { %v813_v41 = vsel %vm809_vm7, %v808_v39, %v802_v34  ;;  %v810_v42 = vsel %vm809_vm7, %v806_v40, %v808_v39  ;;  %v811_v43 = vsel %vm809_vm7, %v804_v33, %v806_v40 }
 0x14d   : > { %v822_v44 = vsel %vm435_vm9, %v813_v41, 0.0  ;;  %v824_v45 = vsel %vm2698_vm10, %v811_v43, 0.0  ;;  %v825_v46 = vsel %vm2702_vm11, %v810_v42, 0.0 }
 0x14e   : > { %1826 = vmatpush1.msk.msra.mxu0 %vm449_vm0, %v822_v44  ;;  %1828 = vmatprep.subr.msk.mxu1 %vm449_vm0, %v825_v46 }
 0x14f   : > { %1829 = vmatpush1.msk.msra.mxu1 %vm449_vm0, %v824_v45 }
 0x150   : > { %1827 = vmatmul.mubr.msk.f32.vlgmr.msra.gmra.mrb[0].mxu0 %vm445_vm1, %v800_v47  ;;  %1830 = vmatmul.mubr.msk.f32.vlgmr.msra.gmra.mrb[0].mxu1 %vm445_vm1, %v800_v47 }
 0x151   : > { %1061 = vmatprep.mubr.f32.mxu0 %v2286_v0  ;;  %1132 = vmatprep.mubr.f32.mxu1 %v2286_v0 }
 0x15c   : > { %v603_v48 = vpop.permute.xlu0 %602 }
 0x223   : > { %v978_v49 = vpop.f32.mrb[0].mxu1  ;;  %v907_v50 = vpop.f32.mrb[0].mxu0 }
 0x224   : > { %v1858_v51 = vadd.f32 %v907_v50, %v603_v48  ;;  %v909_v52 = vpop.f32.mrb[1].mxu0  ;;  %v980_v53 = vpop.f32.mrb[1].mxu1  ;;  %v1860_v54 = vadd.f32 %v978_v49, %v603_v48 }
 0x225   : > { %v1859_v55 = vadd.f32 %v909_v52, %v603_v48  ;;  %v1861_v56 = vadd.f32 %v980_v53, %v603_v48 }
 0x226   : > { %v987_v57 = vmax.f32 %v1858_v51, 0.0  ;;  %v989_v58 = vmax.f32 %v1860_v54, 0.0 }
 0x227   : > { %v988_v59 = vmax.f32 %v1859_v55, 0.0  ;;  %v990_v60 = vmax.f32 %v1861_v56, 0.0 }
 0x228   : > { %1154 = vrot.lane.b32.xlu0 %v989_v58, %s2287_s8  ;;  %1150 = vrot.lane.b32.xlu1 %v987_v57, %s2287_s8 }
 0x229   : > { %997 = vmatprep.subr.mxu0 %v988_v59  ;;  %1068 = vmatprep.subr.mxu1 %v990_v60 }
 0x22a   : > { %998 = vmatpush1.msra.mxu0 %v987_v57  ;;  %1069 = vmatpush1.msra.mxu1 %v989_v58 }
 0x22b   : > { %1831 = vmatmul.mubr.msk.f32.vlgmr.msra.gmra.mrb[2].mxu0 %vm993_vm12, %v992_v61  ;;  %1832 = vmatmul.mubr.msk.f32.vlgmr.msra.gmra.mrb[2].mxu1 %vm993_vm12, %v992_v61 }
 0x22c   : > { %1317 = vrot.lane.b32.xlu0 %v987_v57, %s2289_s13  ;;  %1152 = vrot.lane.b32.xlu1 %v988_v59, %s2287_s8 }
 0x22d   : > { %1233 = vmatprep.mubr.f32.mxu0 %v2286_v0  ;;  %1304 = vmatprep.mubr.f32.mxu1 %v2286_v0 }
 0x230   : > { %1321 = vrot.lane.b32.xlu0 %v989_v58, %s2289_s13  ;;  %1156 = vrot.lane.b32.xlu1 %v990_v60, %s2287_s8 }
 0x234   : > { %1141 = vperm.xlu0 %1995, %v991_v62   ;;  %1319 = vrot.lane.b32.xlu1 %v988_v59, %s2289_s13 }
 0x238   : > { %1323 = vrot.lane.b32.xlu1 %v990_v60, %s2289_s13 }
 0x23c   : > { %1490 = vperm.xlu1 %1996, %v1487_v63  }
 0x29a   : > { %v1151_v5 = vpop.permute.xlu1 %1150  ;;  %v1155_v6 = vpop.permute.xlu0 %1154 }
 0x29e   : > { %v1153_v7 = vpop.permute.xlu1 %1152  ;;  %v1318_v14 = vpop.permute.xlu0 %1317 }
 0x29f   : > { %v1160_v8 = vsel %vm621_vm2, %v1151_v5, %v1153_v7  ;;  %v1159_v15 = vsel %vm621_vm2, %v1153_v7, %v1155_v6 }
 0x2a0   : > { %1833 = vmatprep.subr.msk.mxu0 %vm2656_vm5, %v1160_v8 }
 0x2a2   : > { %v1157_v10 = vpop.permute.xlu1 %1156  ;;  %v1322_v18 = vpop.permute.xlu0 %1321 }
 0x2a3   : > { %v1158_v12 = vsel %vm621_vm2, %v1155_v6, %v1157_v10  ;;  %v1161_v13 = vsel %vm621_vm2, %v1157_v10, %v1151_v5 }
 0x2a4   : > { %1834 = vmatpush1.msk.msra.mxu0 %vm431_vm3, %v1161_v13  ;;  %1836 = vmatprep.subr.msk.mxu1 %vm2652_vm4, %v1158_v12 }
 0x2a5   : > { %1835 = vmatmul.mubr.msk.f32.vlgmr.msra.gmra.mrb[2].mxu0 %vm993_vm12, %v1149_v11  ;;  %1837 = vmatpush1.msk.msra.mxu1 %vm2660_vm6, %v1159_v15 }
 0x2a6   : > { %1838 = vmatmul.mubr.msk.f32.vlgmr.msra.gmra.mrb[2].mxu1 %vm993_vm12, %v1149_v11  ;;  %v1320_v16 = vpop.permute.xlu1 %1319  ;;  %1400 = vmatprep.mubr.f32.mxu0 %v2286_v0 }
 0x2a7   : > { %v1327_v17 = vsel %vm809_vm7, %v1318_v14, %v1320_v16  ;;  %1471 = vmatprep.mubr.f32.mxu1 %v2286_v0  ;;  %v1326_v23 = vsel %vm809_vm7, %v1320_v16, %v1322_v18 }
 0x2a8   : > { %1839 = vmatprep.subr.msk.mxu0 %vm2683_vm8, %v1327_v17 }
 0x2aa   : > { %v1324_v19 = vpop.permute.xlu1 %1323 }
 0x2ab   : > { %v1325_v20 = vsel %vm809_vm7, %v1322_v18, %v1324_v19  ;;  %v1328_v22 = vsel %vm809_vm7, %v1324_v19, %v1318_v14 }
 0x2ac   : > { %1840 = vmatpush1.msk.msra.mxu0 %vm435_vm9, %v1328_v22  ;;  %1842 = vmatprep.subr.msk.mxu1 %vm2702_vm11, %v1325_v20 }
 0x2ad   : > { %1841 = vmatmul.mubr.msk.f32.vlgmr.msra.gmra.mrb[2].mxu0 %vm993_vm12, %v1316_v21  ;;  %1843 = vmatpush1.msk.msra.mxu1 %vm2698_vm10, %v1326_v23 }
 0x2ae   : > { %1844 = vmatmul.mubr.msk.f32.vlgmr.msra.gmra.mrb[2].mxu1 %vm993_vm12, %v1316_v21  ;;  %1845 = vmatprep.subr.msk.mxu0 %vm449_vm0, %v2619_v4 }
 0x2af   : > { %1846 = vmatpush1.msk.msra.mxu0 %vm449_vm0, %v2607_v2  ;;  %1560 = vmatprep.mubr.f32.mxu0 %v2286_v0 }
 0x2b0   : > { %1848 = vmatprep.subr.msk.mxu1 %vm449_vm0, %v2615_v3  ;;  %1631 = vmatprep.mubr.f32.mxu1 %v2286_v0 }
 0x2b1   : > { %1847 = vmatmul.mubr.msk.f32.vlgmr.msra.gmra.mrb[4].mxu0 %vm445_vm1, %v1486_v24  ;;  %1849 = vmatpush1.msk.msra.mxu1 %vm449_vm0, %v2605_v1 }
 0x2b2   : > { %1850 = vmatmul.mubr.msk.f32.vlgmr.msra.gmra.mrb[4].mxu1 %vm445_vm1, %v1486_v24 }
 0x2b3   : > { %v1142_v4 = vpop.permute.xlu0 %1141 }
 0x2bb   : > { %v1491_v30 = vpop.permute.xlu1 %1490 }
 0x380   : > { %v1402_v9 = vpop.f32.mrb[2].mxu0 }
 0x381   : > { %v1862_v25 = vadd.f32 %v1402_v9, %v1142_v4  ;;  %v1404_v26 = vpop.f32.mrb[3].mxu0  ;;  %v1473_v2 = vpop.f32.mrb[2].mxu1 }
 0x382   : > { %v1863_v27 = vadd.f32 %v1404_v26, %v1142_v4  ;;  %v1864_v28 = vadd.f32 %v1473_v2, %v1142_v4  ;;  %v1475_v29 = vpop.f32.mrb[3].mxu1 }
 0x383   : > { %v1865_v3 = vadd.f32 %v1475_v29, %v1142_v4  ;;  %v1482_v31 = vmax.f32 %v1862_v25, 0.0 }
 0x384   : > { %v1562_v0 = vpop.f32.mrb[4].mxu0  ;;  %v1483_v1 = vmax.f32 %v1863_v27, 0.0  ;;  %v1484_v35 = vmax.f32 %v1864_v28, 0.0 }
 0x385   : > { %v1563_v32 = vadd.f32 %v1562_v0, %v1491_v30  ;;  %v1564_v33 = vpop.f32.mrb[5].mxu0  ;;  %v1633_v34 = vpop.f32.mrb[4].mxu1  ;;  %v1485_v39 = vmax.f32 %v1865_v3, 0.0 }
 0x386   : > { %v1565_v36 = vadd.f32 %v1564_v33, %v1491_v30  ;;  %v1634_v37 = vadd.f32 %v1633_v34, %v1491_v30  ;;  %v1635_v38 = vpop.f32.mrb[5].mxu1 }
 0x387   : > { %v1638_v40 = vadd.f32 %v1563_v32, %v1482_v31  ;;  %v1636_v41 = vadd.f32 %v1635_v38, %v1491_v30 }
 0x388   : > { %v1639_v42 = vadd.f32 %v1565_v36, %v1483_v1  ;;  %v1640_v43 = vadd.f32 %v1634_v37, %v1484_v35 }
 0x389   : > { %v1642_v44 = vmax.f32 %v1638_v40, 0.0  ;;  %v1641_v45 = vadd.f32 %v1636_v41, %v1485_v39 }
 0x38a   : > { %v1643_v46 = vmax.f32 %v1639_v42, 0.0  ;;  %v1644_v47 = vmax.f32 %v1640_v43, 0.0 }
 0x38b   : > { %1646 = vst [vmem:[%s373_s19] sm:$0xff] %v1642_v44  ;;  %v1645_v48 = vmax.f32 %v1641_v45, 0.0 }
 0x38c   : > { %1647 = vst [vmem:[%s373_s19 + $0x8] sm:$0xff] %v1643_v46  ;;  %1648 = vst [vmem:[%s373_s19 + $0x10] sm:$0xff] %v1644_v47 }
 0x38d   : > { %1649 = vst [vmem:[%s373_s19 + $0x18] sm:$0xff] %v1645_v48 }
 0x38e   : > { %2210 = shalt.err (!%p2207_p0)
}
 0x38f   : > { %s2211_s29 = scalar_lea.hbm %s2793_s21, 512  ;;  %s2215_s9 = scalar_lea.hbm %s2844_s7, 1024 }
 0x390   : > { %p2212_p4 = scmp.ne.s32.totalorder %s2793_s21, %s2211_s29  ;;  %p2216_p8 = scmp.lt.u32.totalorder %s2793_s21, %s2844_s7 }
 0x391   : > { %p2217_p5 = scmp.lt.u32.totalorder %s2215_s9, %s2211_s29  ;;  %p2219_p6 = scmp.lt.u32.totalorder %s2211_s29, %s2793_s21 }
 0x392   : > { %p2213_p10 = pnand %p2212_p4, %p2876_p9 }
 0x393   : > { %p2218_p7 = por %p2217_p5, %p2216_p8 }
 0x394   : > { %p2214_p11 = pneg %p2213_p10 }
 0x395   : > { %p2220_p12 = por %p2219_p6, %p2218_p7 }
 0x397   : > { %p2221_p13 = pnand %p2220_p12, %p2214_p11 }
 0x399   : > { %2224 = shalt.err (!%p2221_p13)
}
 0x39a   : > { %1908 = dma.vmem_to_hbm [thread:$0]  (%p2876_p9), %s2795_s17, 512, %s2793_s21, %s1651_s30  }
 0x39b PF: > { %s1677_s10 = sand.u32 1, %s2263_s24   ;;  %p2877_p1 = scmp.ne.s32.totalorder %s2855_s28, 0 }
 0x39c   : > { %p2878_p3 = scmp.ge.s32.totalorder %s2275_s27, 2  ;;  %s1678_s15 = scalar_lea.sflag [#allocation4], %s1677_s10 }
 0x39e   : > { %p1934_p2 = pnand %p2878_p3, %p2877_p1 }
 0x3a0   : > { %2258 = dma.done.wait (!%p1934_p2), %s1678_s15, 512  }
 0x3a1   : > { %2260 = vsyncadd (!%p1934_p2), %s1678_s15, 4294966784  ;;  %p23_p0 = scmp.ge.s32.totalorder %s2507_s11, 4   ;;  %s2879_s24 = smov %s2267_s25 }
 0x3a2   : > { %s2880_s25 = smov %s2271_s26  ;;  %s2881_s26 = smov %s2518_s18 }
 0x3a3   : > { %s2882_s27 = smov %s2507_s11  ;;  %25 = sbr.rel (!%p23_p0) target bundleno = 8 (0x8), region = 121 }
 0x3aa   :  { %1683 = vsyncpa [#allocation3], 1 }
 0x3ab   :  { %1685 = vsyncpa [#allocation3 + $0x1], 1 }
 0x3ac   :  { %1686 = vsyncpa [#allocation6], 1 }
 0x3ad   :  { %1687 = vsyncpa [#allocation9], 1 }
 0x3ae   :  { %1688 = vsyncpa [#allocation12], 1 }
 0x3af   :  { %1689 = vsyncpa [#allocation4], 1 }
 0x3b0   :  { %1691 = vsyncpa [#allocation4 + $0x1], 1 }

// kernel: tpu_custom_call.1
= control target key start
LH: loop header
LB: loop body
LE: loop exit
PB: predicated region body
PF: predicated region fallthrough
CT: control target
= control target key end

     0   :  { %12 = vsyncpa [#allocation3], 0  ;;  %s2837_s0 = inlined_call_operand.hbm [shape: f32[4,1024], index: 0, kind: input, shape index: {}]   ;;  %s2838_s1 = inlined_call_operand.hbm [shape: f32[3,8,4], index: 1, kind: input, shape index: {}]   ;;  %s2839_s2 = inlined_call_operand.hbm [shape: f32[8,1], index: 2, kind: input, shape index: {}]   ;;  %s2840_s3 = inlined_call_operand.hbm [shape: f32[3,8,8], index: 3, kind: input, shape index: {}]   ;;  %s2841_s4 = inlined_call_operand.hbm [shape: f32[8,1], index: 4, kind: input, shape index: {}]   ;;  %s2842_s5 = inlined_call_operand.hbm [shape: f32[8,4], index: 5, kind: input, shape index: {}]   ;;  %s2843_s6 = inlined_call_operand.hbm [shape: f32[8,1], index: 6, kind: input, shape index: {}]   ;;  %s2844_s7 = inlined_call_operand.hbm [shape: f32[8,1024], index: 7, kind: output, shape index: {}]  }
   0x1   :  { %14 = vsyncpa [#allocation3 + $0x1], 0 }
   0x2   :  { %15 = vsyncpa [#allocation6], 0 }
   0x3   :  { %16 = vsyncpa [#allocation9], 0 }
   0x4   :  { %17 = vsyncpa [#allocation12], 0 }
   0x5   :  { %18 = vsyncpa [#allocation4], 0 }
   0x6   :  { %20 = vsyncpa [#allocation4 + $0x1], 0  ;;  %s2331_s24 = smov 0   ;;  %s2333_s25 = smov 0  }
   0x7   :  { %s2335_s26 = smov 0   ;;  %s2337_s27 = smov 0  }
   0x8 LB: > { %s2277_s28 = smov [#allocation5]   ;;  %s2352_s30 = sadd.s32 4294967295, %s2275_s27   ;;  %s2275_s27 = sphi %s2337_s27, %s2882_s27   ;;  %s2271_s26 = sphi %s2335_s26, %s2881_s26   ;;  %s2267_s25 = sphi %s2333_s25, %s2880_s25   ;;  %s2263_s24 = sphi %s2331_s24, %s2879_s24  }
   0x9   : > { %s221_s29 = sshll.u32 %s2277_s28, 4  ;;  %p1793_p0 = scmp.ge.s32.totalorder %s2275_s27, 1  ;;  %s2357_s29 = int_to_ptr.vmem [resolvable:$true] %s221_s29 }
   0xa   : > { %p2845_p1 = scmp.eq.s32.totalorder %s2352_s30, 0  ;;  %p209_p2 = scmp.lt.s32.totalorder %s2275_s27, 3 }
   0xb   : > { %s2278_s9 = smov [#allocation8]   ;;  %s2279_s12 = smov [#allocation11]  }
   0xc   : > { %p2359_p3 = pnand %p1793_p0, %p209_p2  ;;  %s245_s10 = sshll.u32 %s2278_s9, 4  ;;  %s2372_s10 = int_to_ptr.vmem [resolvable:$true] %s245_s10 }
   0xd   : > { %s270_s13 = sshll.u32 %s2279_s12, 4  ;;  %s1999_s16 = scalar_lea.hbm %s2838_s1, 384  ;;  %s2374_s13 = int_to_ptr.vmem [resolvable:$true] %s270_s13 }
   0xe   : > { %s2848_s8 = scalar_select %p2359_p3, 1, 0 }
   0xf   : > { %p1910_p5 = pneg %p2359_p3  ;;  %p2000_p7 = scmp.ne.s32.totalorder %s2838_s1, %s1999_s16 }
  0x10   : > { %p2006_p11 = scmp.lt.u32.totalorder %s1999_s16, %s2838_s1 }
  0x11   : > { %p2368_p6 = pnand %p1910_p5, %p2845_p1 }
  0x13   : > { %p2384_p8 = pneg %p2368_p6 }
  0x15   : > { %p2002_p9 = pnand %p2384_p8, %p2000_p7 }
  0x17   : > { %p2003_p10 = pneg %p2002_p9 }
  0x19   : > { %p2008_p12 = pnand %p2006_p11, %p2003_p10 }
  0x1b   : > { %2011 = shalt.err (!%p2008_p12)
}
  0x1c   : > { %s2012_s22 = scalar_lea.vmem %s2357_s29, 384  ;;  %p2020_p5 = scmp.lt.s32.totalorder %s2357_s29, %s2357_s29 }
  0x1d   : > { %p2013_p13 = scmp.ne.s32.totalorder %s2357_s29, %s2012_s22  ;;  %p2021_p4 = scmp.lt.s32.totalorder %s2012_s22, %s2012_s22 }
  0x1f   : > { %p2015_p0 = pnand %p2013_p13, %p2384_p8  ;;  %p2022_p7 = por %p2021_p4, %p2020_p5 }
  0x21   : > { %p2016_p2 = pneg %p2015_p0 }
  0x23   : > { %p2023_p9 = pnand %p2022_p7, %p2016_p2 }
  0x25   : > { %2026 = shalt.err (!%p2023_p9)
}
  0x26   : > { %s2280_s23 = smov 128   ;;  %s2281_s28 = smov 8  }
  0x27   : > { %1913 = dma.hbm_to_vmem [thread:$0]  (!%p2368_p6), %s2838_s1, 384, %s2357_s29, [#allocation6], %s2280_s23, %s2280_s23, %s2281_s28  }
  0x28   : > { %s2027_s16 = scalar_lea.hbm %s2840_s3, 384 }
  0x29   : > { %p2028_p4 = scmp.ne.s32.totalorder %s2840_s3, %s2027_s16  ;;  %p2034_p12 = scmp.lt.u32.totalorder %s2027_s16, %s2840_s3 }
  0x2b   : > { %p2030_p10 = pnand %p2028_p4, %p2384_p8 }
  0x2d   : > { %p2031_p11 = pneg %p2030_p10 }
  0x2f   : > { %p2036_p13 = pnand %p2034_p12, %p2031_p11 }
  0x31   : > { %2039 = shalt.err (!%p2036_p13)
}
  0x32   : > { %s2040_s29 = scalar_lea.vmem %s2372_s10, 384  ;;  %p2048_p7 = scmp.lt.s32.totalorder %s2372_s10, %s2372_s10 }
  0x33   : > { %p2041_p0 = scmp.ne.s32.totalorder %s2372_s10, %s2040_s29  ;;  %p2049_p9 = scmp.lt.s32.totalorder %s2040_s29, %s2040_s29 }
  0x35   : > { %p2043_p2 = pnand %p2041_p0, %p2384_p8  ;;  %p2050_p4 = por %p2049_p9, %p2048_p7 }
  0x37   : > { %p2044_p5 = pneg %p2043_p2 }
  0x39   : > { %p2051_p10 = pnand %p2050_p4, %p2044_p5 }
  0x3b   : > { %2054 = shalt.err (!%p2051_p10)
}
  0x3c   : > { %1919 = dma.hbm_to_vmem [thread:$0]  (!%p2368_p6), %s2840_s3, 384, %s2372_s10, [#allocation9], %s2280_s23, %s2280_s23, %s2281_s28  }
  0x3d   : > { %s2055_s15 = scalar_lea.hbm %s2842_s5, 128 }
  0x3e   : > { %p2056_p11 = scmp.ne.s32.totalorder %s2842_s5, %s2055_s15  ;;  %p2062_p0 = scmp.lt.u32.totalorder %s2055_s15, %s2842_s5 }
  0x40   : > { %p2058_p12 = pnand %p2056_p11, %p2384_p8 }
  0x42   : > { %p2059_p13 = pneg %p2058_p12 }
  0x44   : > { %p2064_p2 = pnand %p2062_p0, %p2059_p13 }
  0x46   : > { %2067 = shalt.err (!%p2064_p2)
}
  0x47   : > { %s2068_s10 = scalar_lea.vmem %s2374_s13, 128  ;;  %p2076_p4 = scmp.lt.s32.totalorder %s2374_s13, %s2374_s13 }
  0x48   : > { %p2069_p5 = scmp.ne.s32.totalorder %s2374_s13, %s2068_s10  ;;  %p2077_p10 = scmp.lt.s32.totalorder %s2068_s10, %s2068_s10 }
  0x4a   : > { %p2071_p7 = pnand %p2069_p5, %p2384_p8  ;;  %p2078_p11 = por %p2077_p10, %p2076_p4 }
  0x4c   : > { %p2072_p9 = pneg %p2071_p7 }
  0x4e   : > { %p2079_p12 = pnand %p2078_p11, %p2072_p9 }
  0x50   : > { %2082 = shalt.err (!%p2079_p12)
}
  0x51   : > { %1925 = dma.hbm_to_vmem [thread:$0]  (!%p2368_p6), %s2842_s5, 128, %s2374_s13, [#allocation12]  }
  0x52   : > { %s2282_s21 = smov [#allocation7]   ;;  %s2283_s22 = smov [#allocation10]  }
  0x53   : > { %s235_s29 = sshll.u32 %s2282_s21, 4  ;;  %s259_s9 = sshll.u32 %s2283_s22, 4  ;;  %s236_s29 = int_to_ptr.vmem [resolvable:$true] %s235_s29  ;;  %s260_s9 = int_to_ptr.vmem [resolvable:$true] %s259_s9 }
  0x54   : > { %s2083_s15 = scalar_lea.hbm %s2839_s2, 128 }
  0x55   : > { %p2084_p13 = scmp.ne.s32.totalorder %s2839_s2, %s2083_s15  ;;  %p2090_p5 = scmp.lt.u32.totalorder %s2083_s15, %s2839_s2 }
  0x57   : > { %p2086_p0 = pnand %p2084_p13, %p2384_p8 }
  0x59   : > { %p2087_p2 = pneg %p2086_p0 }
  0x5b   : > { %p2092_p7 = pnand %p2090_p5, %p2087_p2 }
  0x5d   : > { %2095 = shalt.err (!%p2092_p7)
}
  0x5e   : > { %s2096_s13 = scalar_lea.vmem %s236_s29, 128  ;;  %p2104_p11 = scmp.lt.s32.totalorder %s236_s29, %s236_s29 }
  0x5f   : > { %p2097_p9 = scmp.ne.s32.totalorder %s236_s29, %s2096_s13  ;;  %p2105_p12 = scmp.lt.s32.totalorder %s2096_s13, %s2096_s13 }
  0x61   : > { %p2099_p4 = pnand %p2097_p9, %p2384_p8  ;;  %p2106_p1 = por %p2105_p12, %p2104_p11 }
  0x63   : > { %p2100_p10 = pneg %p2099_p4 }
  0x65   : > { %p2107_p3 = pnand %p2106_p1, %p2100_p10 }
  0x67   : > { %2110 = shalt.err (!%p2107_p3)
}
  0x68   : > { %1916 = dma.hbm_to_vmem [thread:$0]  (!%p2368_p6), %s2839_s2, 128, %s236_s29, [#allocation6]  }
  0x69   : > { %s2111_s22 = scalar_lea.hbm %s2841_s4, 128 }
  0x6a   : > { %p2112_p13 = scmp.ne.s32.totalorder %s2841_s4, %s2111_s22  ;;  %p2118_p3 = scmp.lt.u32.totalorder %s2111_s22, %s2841_s4 }
  0x6c   : > { %p2114_p0 = pnand %p2112_p13, %p2384_p8 }
  0x6e   : > { %p2115_p1 = pneg %p2114_p0 }
  0x70   : > { %p2120_p2 = pnand %p2118_p3, %p2115_p1 }
  0x72   : > { %2123 = shalt.err (!%p2120_p2)
}
  0x73   : > { %s2124_s17 = scalar_lea.vmem %s260_s9, 128  ;;  %p2132_p4 = scmp.lt.s32.totalorder %s260_s9, %s260_s9 }
  0x74   : > { %p2125_p5 = scmp.ne.s32.totalorder %s260_s9, %s2124_s17  ;;  %p2133_p10 = scmp.lt.s32.totalorder %s2124_s17, %s2124_s17 }
  0x76   : > { %p2127_p7 = pnand %p2125_p5, %p2384_p8  ;;  %p2134_p11 = por %p2133_p10, %p2132_p4 }
  0x78   : > { %p2128_p9 = pneg %p2127_p7 }
  0x7a   : > { %p2135_p12 = pnand %p2134_p11, %p2128_p9 }
  0x7c   : > { %2138 = shalt.err (!%p2135_p12)
}
  0x7d   : > { %1922 = dma.hbm_to_vmem [thread:$0]  (!%p2368_p6), %s2841_s4, 128, %s260_s9, [#allocation9]  }
  0x7e   : > { %s2284_s20 = smov [#allocation13]   ;;  %s2139_s28 = scalar_lea.hbm %s2843_s6, 128 }
  0x7f   : > { %s281_s13 = sshll.u32 %s2284_s20, 4  ;;  %p2140_p13 = scmp.ne.s32.totalorder %s2843_s6, %s2139_s28  ;;  %s282_s13 = int_to_ptr.vmem [resolvable:$true] %s281_s13 }
  0x80   : > { %p2146_p3 = scmp.lt.u32.totalorder %s2139_s28, %s2843_s6 }
  0x81   : > { %p2142_p0 = pnand %p2140_p13, %p2384_p8 }
  0x83   : > { %p2143_p1 = pneg %p2142_p0 }
  0x85   : > { %p2148_p2 = pnand %p2146_p3, %p2143_p1 }
  0x87   : > { %2151 = shalt.err (!%p2148_p2)
}
  0x88   : > { %s2152_s9 = scalar_lea.vmem %s282_s13, 128  ;;  %p2160_p4 = scmp.lt.s32.totalorder %s282_s13, %s282_s13 }
  0x89   : > { %p2153_p5 = scmp.ne.s32.totalorder %s282_s13, %s2152_s9  ;;  %p2161_p10 = scmp.lt.s32.totalorder %s2152_s9, %s2152_s9 }
  0x8b   : > { %p2155_p7 = pnand %p2153_p5, %p2384_p8  ;;  %p2162_p11 = por %p2161_p10, %p2160_p4 }
  0x8d   : > { %p2156_p9 = pneg %p2155_p7 }
  0x8f   : > { %p2163_p12 = pnand %p2162_p11, %p2156_p9 }
  0x91   : > { %2166 = shalt.err (!%p2163_p12)
}
  0x92   : > { %1928 = dma.hbm_to_vmem [thread:$0]  (!%p2368_p6), %s2843_s6, 128, %s282_s13, [#allocation12]  }
  0x93   : > { %s1792_s19 = sadd.s32 4294967294, %s2275_s27   ;;  %s2507_s11 = sadd.s32 1, %s2275_s27  }
  0x94   : > { %s30_s17 = ssub.s32 %s2275_s27, %s2507_s11  ;;  %s33_s29 = sadd.s32 1, %s2271_s26 }
  0x95   : > { %p31_p8 = scmp.eq.s32.totalorder %s30_s17, 0  ;;  %p40_p13 = scmp.ne.s32.totalorder %s2271_s26, %s2267_s25 }
  0x96   : > { %p41_p0 = scmp.eq.s32.totalorder %s2275_s27, 0  ;;  %p46_p1 = scmp.ne.s32.totalorder %s2267_s25, %s2263_s24 }
  0x97   : > { %s2518_s18 = scalar_select %p31_p8, %s2271_s26, %s33_s29  }
  0x98   : > { %p2520_p3 = por %p41_p0, %p40_p13  ;;  %p2852_p2 = scmp.eq.s32.totalorder %s2352_s30, 0 }
  0x99   : > { %p196_p5 = scmp.eq.s32.totalorder %s2352_s30, 1  ;;  %p202_p7 = scmp.eq.s32.totalorder %s1792_s19, 1 }
  0x9a   : > { %p2526_p6 = por %p2852_p2, %p46_p1  ;;  %p1943_p9 = scmp.lt.s32.totalorder %s2275_s27, 2 }
  0x9b   : > { %s292_s10 = sand.u32 1, %s2271_s26   ;;  %p2533_p4 = por %p196_p5, %p40_p13 }
  0x9c   : > { %p2537_p10 = por %p202_p7, %p46_p1  ;;  %s1801_s21 = sshll.u32 %s292_s10, 4 }
  0x9d   : > { %s2854_s23 = scalar_select %p2533_p4, 1, 0 }
  0x9e   : > { %s2855_s28 = scalar_select %p2537_p10, 1, 0 }
  0x9f   : > { %s1856_s22 = sshll.u32 %s2275_s27, 8  ;;  %s296_s15 = scalar_lea.vmem [#allocation2], %s1801_s21 }
  0xa0   : > { %s2545_s9 = scalar_lea.hbm %s2837_s0, %s1856_s22  ;;  %s304_s16 = sshll.u32 %s296_s15, 4  ;;  %s2547_s16 = int_to_ptr.vmem [resolvable:$true] %s304_s16 }
  0xa1   : > { %p2551_p11 = pnand %p1943_p9, %p2520_p3  ;;  %s293_s17 = scalar_lea.sflag [#allocation3], %s292_s10 }
  0xa2   : > { %s2167_s29 = scalar_lea.hbm %s2545_s9, 256  ;;  %s2172_s12 = scalar_lea.hbm %s2837_s0, 512 }
  0xa3   : > { %p2168_p12 = scmp.ne.s32.totalorder %s2545_s9, %s2167_s29  ;;  %p2169_p8 = pneg %p2551_p11 }
  0xa4   : > { %p2173_p1 = scmp.lt.u32.totalorder %s2545_s9, %s2837_s0  ;;  %p2174_p3 = scmp.lt.u32.totalorder %s2172_s12, %s2167_s29 }
  0xa5   : > { %p2170_p13 = pnand %p2169_p8, %p2168_p12  ;;  %p2176_p5 = scmp.lt.u32.totalorder %s2167_s29, %s2545_s9 }
  0xa6   : > { %p2175_p2 = por %p2174_p3, %p2173_p1 }
  0xa7   : > { %p2171_p0 = pneg %p2170_p13 }
  0xa8   : > { %p2177_p7 = por %p2176_p5, %p2175_p2 }
  0xaa   : > { %p2178_p9 = pnand %p2177_p7, %p2171_p0 }
  0xac   : > { %2181 = shalt.err (!%p2178_p9)
}
  0xad   : > { %s2182_s10 = scalar_lea.vmem %s2547_s16, 256  ;;  %s2285_s15 = smov [#allocation2]  }
  0xae   : > { %p2183_p12 = scmp.ne.s32.totalorder %s2547_s16, %s2182_s10  ;;  %s2187_s21 = sshll.u32 %s2285_s15, 4  ;;  %s2188_s21 = int_to_ptr.vmem [resolvable:$false] %s2187_s21 }
  0xaf   : > { %s2189_s22 = scalar_lea.vmem %s2188_s21, 512  ;;  %p2190_p4 = scmp.lt.s32.totalorder %s2547_s16, %s2188_s21 }
  0xb0   : > { %p2185_p13 = pnand %p2183_p12, %p2169_p8  ;;  %p2191_p1 = scmp.lt.s32.totalorder %s2189_s22, %s2182_s10 }
  0xb2   : > { %p2186_p10 = pneg %p2185_p13  ;;  %p2192_p3 = por %p2191_p1, %p2190_p4 }
  0xb4   : > { %p2193_p2 = pnand %p2192_p3, %p2186_p10 }
  0xb6   : > { %2196 = shalt.err (!%p2193_p2)
}
  0xb7   : > { %1932 = dma.hbm_to_vmem [thread:$0]  (!%p2551_p11), %s2545_s9, 256, %s2547_s16, %s293_s17  }
  0xb8   : > { %p2857_p0 = scmp.ne.s32.totalorder %s2848_s8, 0 }
  0xb9   : > { %s2583_s29 = sand.u32 (!%p2857_p0), 1, %s2267_s25  }
  0xba   : > { %313 = sbr.rel (%p2857_p0) target bundleno = 923 (0x39b), region = 48  ;;  %s1805_s12 = sshll.u32 (!%p2857_p0), %s2583_s29, 4 }
  0xbb   : > { %s316_s20 = scalar_lea.sflag (!%p2857_p0), [#allocation3], %s2583_s29  ;;  %s319_s14 = scalar_lea.vmem (!%p2857_p0), [#allocation2], %s1805_s12 }
  0xc1   : > { %2242 = dma.done.wait (%p2526_p6), %s316_s20, 256  }
  0xc2   : > { %2244 = vsyncadd (%p2526_p6), %s316_s20, 4294967040  ;;  %p2858_p4 = scmp.eq.s32.totalorder %s2352_s30, 0 }
  0xc4   : > { %2246 = dma.done.wait (%p2858_p4), [#allocation6], 512   ;;  %p2859_p10 = pmov %p2858_p4 }
  0xc5   : > { %p2860_p11 = pmov %p2858_p4 }
  0xc6   : > { %2248 = vsyncadd (%p2859_p10), [#allocation6], 4294966784 }
  0xc7   : > { %2250 = dma.done.wait (%p2860_p11), [#allocation9], 512   ;;  %p2861_p8 = pmov %p2858_p4 }
  0xc8   : > { %p2862_p5 = pmov %p2858_p4 }
  0xc9   : > { %2252 = vsyncadd (%p2861_p8), [#allocation9], 4294966784 }
  0xca   : > { %2254 = dma.done.wait (%p2862_p5), [#allocation12], 256   ;;  %p2863_p7 = pmov %p2858_p4 }
  0xcb   : > { %v2286_v0 = vmov 0.0   ;;  %v2605_v1 = vld [vmem:[%s319_s14 + $0x8] sm:$0xff]  ;;  %v2607_v2 = vld [vmem:[%s319_s14] sm:$0xff]  ;;  %vm449_vm0 = vcmask 1043456   ;;  %s2287_s8 = smov 2   ;;  %vm445_vm1 = vcmask 31744   ;;  %v378_v8 = vlaneseq }
  0xcc   : > { %2256 = vsyncadd (%p2863_p7), [#allocation12], 4294967040  ;;  %522 = vmatprep.mubr.f32.mxu0 %v2286_v0  ;;  %593 = vmatprep.mubr.f32.mxu1 %v2286_v0  ;;  %v2615_v3 = vcombine.high %v2605_v1, %v2605_v1  ;;  %v2619_v4 = vcombine.high %v2607_v2, %v2607_v2  ;;  %v440_v5 = vld [vmem:[#allocation5] sm:$0xff]  ;;  %v2288_v6 = vmov 0   ;;  %s2289_s13 = smov 4   ;;  %v439_v7 = vld [vmem:[#allocation7] sm:$0xff] }
  0xcd   : > { %617 = vrot.lane.b32.xlu1 %v2605_v1, %s2287_s8  ;;  %613 = vrot.lane.b32.xlu0 %v2607_v2, %s2287_s8  ;;  %v2645_v9 = vand.u32 127, %v378_v8  ;;  %v610_v31 = vld [vmem:[#allocation5 + $0x8] sm:$0xff]  ;;  %v800_v47 = vld [vmem:[#allocation5 + $0x10] sm:$0xff]  ;;  %v992_v61 = vld [vmem:[#allocation8] sm:$0xff]  ;;  %vm993_vm12 = vcmask 64512   ;;  %s1812_s9 = sshll.u32 %s2583_s29, 5 }
  0xce   : > { %1813 = vmatprep.subr.msk.mxu0 %vm449_vm0, %v2619_v4  ;;  %1816 = vmatprep.subr.msk.mxu1 %vm449_vm0, %v2615_v3  ;;  %v991_v62 = vld [vmem:[#allocation10] sm:$0xff]  ;;  %v1487_v63 = vld [vmem:[#allocation13] sm:$0xff]  ;;  %s1857_s16 = sshll.u32 %s2352_s30, 9  ;;  %s373_s19 = scalar_lea.vmem [#allocation14], %s1812_s9 }
  0xcf   : > { %1817 = vmatpush1.msk.msra.mxu1 %vm449_vm0, %v2605_v1  ;;  %1814 = vmatpush1.msk.msra.mxu0 %vm449_vm0, %v2607_v2  ;;  %v382_v10 = vadd.s32 384, %v2645_v9  ;;  %v380_v11 = vadd.s32 128, %v2645_v9  ;;  %v381_v12 = vadd.s32 256, %v2645_v9  ;;  %vm621_vm2 = vcmp.lt.s32.totalorder %v2645_v9, 2  ;;  %s1665_s17 = sshll.u32 %s373_s19, 4  ;;  %s2793_s21 = scalar_lea.hbm %s2844_s7, %s1857_s16  ;;  %s2795_s17 = int_to_ptr.vmem [resolvable:$true] %s1665_s17 }
  0xd0   : > { %1815 = vmatmul.mubr.msk.f32.vlgmr.msra.gmra.mrb[0].mxu0 %vm445_vm1, %v440_v5  ;;  %1818 = vmatmul.mubr.msk.f32.vlgmr.msra.gmra.mrb[0].mxu1 %vm445_vm1, %v440_v5  ;;  %vm431_vm3 = vcmp.ge.s32.totalorder %v2645_v9, 2  ;;  %vm809_vm7 = vcmp.lt.s32.totalorder %v2645_v9, 4  ;;  %vm435_vm9 = vcmp.ge.s32.totalorder %v2645_v9, 4  ;;  %s1651_s30 = scalar_lea.sflag [#allocation4], %s2583_s29  ;;  %s2197_s22 = scalar_lea.vmem %s2795_s17, 512 }
  0xd1   : > { %619 = vrot.lane.b32.xlu1 %v2615_v3, %s2287_s8  ;;  %615 = vrot.lane.b32.xlu0 %v2619_v4, %s2287_s8  ;;  %v408_v13 = vand.u32 127, %v382_v10  ;;  %v394_v14 = vand.u32 127, %v380_v11  ;;  %v401_v15 = vand.u32 127, %v381_v12  ;;  %v1149_v11 = vld [vmem:[#allocation8 + $0x8] sm:$0xff]  ;;  %p2198_p6 = scmp.ne.s32.totalorder %s2795_s17, %s2197_s22  ;;  %p2876_p9 = scmp.ne.s32.totalorder %s2854_s23, 0 }
  0xd2   : > { %788 = vmatprep.mubr.f32.mxu1 %v2286_v0  ;;  %717 = vmatprep.mubr.f32.mxu0 %v2286_v0  ;;  %s2290_s12 = smov [#allocation14]  }
  0xd3   : > { %1995 = vset.pattern.permute.xlu0 %v2288_v6  ;;  %1996 = vset.pattern.permute.xlu1 %v2288_v6  ;;  %vm2652_vm4 = vcmp.ge.s32.totalorder %v408_v13, 2  ;;  %vm2656_vm5 = vcmp.ge.s32.totalorder %v394_v14, 2  ;;  %vm2660_vm6 = vcmp.ge.s32.totalorder %v401_v15, 2  ;;  %vm2683_vm8 = vcmp.ge.s32.totalorder %v394_v14, 4  ;;  %p2199_p12 = pnand %p2198_p6, %p2876_p9  ;;  %s2201_s20 = sshll.u32 %s2290_s12, 4  ;;  %s2202_s20 = int_to_ptr.vmem [resolvable:$false] %s2201_s20 }
  0xd4   : > { %vm2698_vm10 = vcmp.ge.s32.totalorder %v401_v15, 4  ;;  %vm2702_vm11 = vcmp.ge.s32.totalorder %v408_v13, 4  ;;  %s2203_s14 = scalar_lea.vmem %s2202_s20, 1024  ;;  %p2204_p1 = scmp.lt.s32.totalorder %s2795_s17, %s2202_s20 }
  0xd5   : > { %803 = vrot.lane.b32.xlu1 %v2619_v4, %s2289_s13  ;;  %801 = vrot.lane.b32.xlu0 %v2607_v2, %s2289_s13  ;;  %p2200_p13 = pneg %p2199_p12  ;;  %p2205_p3 = scmp.lt.s32.totalorder %s2203_s14, %s2197_s22 }
  0xd7   : > { %p2206_p2 = por %p2205_p3, %p2204_p1 }
  0xd9   : > { %807 = vrot.lane.b32.xlu1 %v2615_v3, %s2289_s13  ;;  %805 = vrot.lane.b32.xlu0 %v2605_v1, %s2289_s13  ;;  %p2207_p0 = pnand %p2206_p2, %p2200_p13 }
  0xdd   : > { %602 = vperm.xlu0 %1995, %v439_v7  }
 0x13f   : > { %v618_v16 = vpop.permute.xlu1 %617  ;;  %v614_v17 = vpop.permute.xlu0 %613 }
 0x143   : > { %v620_v21 = vpop.permute.xlu1 %619  ;;  %v616_v22 = vpop.permute.xlu0 %615 }
 0x144   : > { %v622_v23 = vsel %vm621_vm2, %v618_v16, %v620_v21  ;;  %v625_v24 = vsel %vm621_vm2, %v620_v21, %v614_v17  ;;  %v623_v25 = vsel %vm621_vm2, %v616_v22, %v618_v16  ;;  %v624_v26 = vsel %vm621_vm2, %v614_v17, %v616_v22  ;;  %v1316_v21 = vld [vmem:[#allocation8 + $0x10] sm:$0xff] }
 0x145   : > { %v634_v27 = vsel %vm431_vm3, %v625_v24, 0.0  ;;  %v637_v28 = vsel %vm2652_vm4, %v622_v23, 0.0  ;;  %v635_v29 = vsel %vm2656_vm5, %v624_v26, 0.0  ;;  %v636_v30 = vsel %vm2660_vm6, %v623_v25, 0.0  ;;  %v1486_v24 = vld [vmem:[#allocation11] sm:$0xff] }
 0x146   : > { %1819 = vmatprep.subr.msk.mxu0 %vm449_vm0, %v635_v29  ;;  %1822 = vmatprep.subr.msk.mxu1 %vm449_vm0, %v637_v28 }
 0x147   : > { %v804_v33 = vpop.permute.xlu1 %803  ;;  %1823 = vmatpush1.msk.msra.mxu1 %vm449_vm0, %v636_v30  ;;  %v802_v34 = vpop.permute.xlu0 %801  ;;  %1820 = vmatpush1.msk.msra.mxu0 %vm449_vm0, %v634_v27 }
 0x148   : > { %v812_v35 = vsel %vm809_vm7, %v802_v34, %v804_v33  ;;  %1821 = vmatmul.mubr.msk.f32.vlgmr.msra.gmra.mrb[0].mxu0 %vm445_vm1, %v610_v31  ;;  %1824 = vmatmul.mubr.msk.f32.vlgmr.msra.gmra.mrb[0].mxu1 %vm445_vm1, %v610_v31 }
 0x149   : > { %v823_v36 = vsel %vm2683_vm8, %v812_v35, 0.0  ;;  %905 = vmatprep.mubr.f32.mxu0 %v2286_v0  ;;  %976 = vmatprep.mubr.f32.mxu1 %v2286_v0 }
 0x14a   : > { %1825 = vmatprep.subr.msk.mxu0 %vm449_vm0, %v823_v36 }
 0x14b   : > { %v808_v39 = vpop.permute.xlu1 %807  ;;  %v806_v40 = vpop.permute.xlu0 %805 }
 0x14c   : > { %v813_v41 = vsel %vm809_vm7, %v808_v39, %v802_v34  ;;  %v810_v42 = vsel %vm809_vm7, %v806_v40, %v808_v39  ;;  %v811_v43 = vsel %vm809_vm7, %v804_v33, %v806_v40 }
 0x14d   : > { %v822_v44 = vsel %vm435_vm9, %v813_v41, 0.0  ;;  %v824_v45 = vsel %vm2698_vm10, %v811_v43, 0.0  ;;  %v825_v46 = vsel %vm2702_vm11, %v810_v42, 0.0 }
 0x14e   : > { %1826 = vmatpush1.msk.msra.mxu0 %vm449_vm0, %v822_v44  ;;  %1828 = vmatprep.subr.msk.mxu1 %vm449_vm0, %v825_v46 }
 0x14f   : > { %1829 = vmatpush1.msk.msra.mxu1 %vm449_vm0, %v824_v45 }
 0x150   : > { %1827 = vmatmul.mubr.msk.f32.vlgmr.msra.gmra.mrb[0].mxu0 %vm445_vm1, %v800_v47  ;;  %1830 = vmatmul.mubr.msk.f32.vlgmr.msra.gmra.mrb[0].mxu1 %vm445_vm1, %v800_v47 }
 0x151   : > { %1061 = vmatprep.mubr.f32.mxu0 %v2286_v0  ;;  %1132 = vmatprep.mubr.f32.mxu1 %v2286_v0 }
 0x15c   : > { %v603_v48 = vpop.permute.xlu0 %602 }
 0x223   : > { %v978_v49 = vpop.f32.mrb[0].mxu1  ;;  %v907_v50 = vpop.f32.mrb[0].mxu0 }
 0x224   : > { %v1858_v51 = vadd.f32 %v907_v50, %v603_v48  ;;  %v909_v52 = vpop.f32.mrb[1].mxu0  ;;  %v980_v53 = vpop.f32.mrb[1].mxu1  ;;  %v1860_v54 = vadd.f32 %v978_v49, %v603_v48 }
 0x225   : > { %v1859_v55 = vadd.f32 %v909_v52, %v603_v48  ;;  %v1861_v56 = vadd.f32 %v980_v53, %v603_v48 }
 0x226   : > { %v987_v57 = vmax.f32 %v1858_v51, 0.0  ;;  %v989_v58 = vmax.f32 %v1860_v54, 0.0 }
 0x227   : > { %v988_v59 = vmax.f32 %v1859_v55, 0.0  ;;  %v990_v60 = vmax.f32 %v1861_v56, 0.0 }
 0x228   : > { %1154 = vrot.lane.b32.xlu0 %v989_v58, %s2287_s8  ;;  %1150 = vrot.lane.b32.xlu1 %v987_v57, %s2287_s8 }
 0x229   : > { %997 = vmatprep.subr.mxu0 %v988_v59  ;;  %1068 = vmatprep.subr.mxu1 %v990_v60 }
 0x22a   : > { %998 = vmatpush1.msra.mxu0 %v987_v57  ;;  %1069 = vmatpush1.msra.mxu1 %v989_v58 }
 0x22b   : > { %1831 = vmatmul.mubr.msk.f32.vlgmr.msra.gmra.mrb[2].mxu0 %vm993_vm12, %v992_v61  ;;  %1832 = vmatmul.mubr.msk.f32.vlgmr.msra.gmra.mrb[2].mxu1 %vm993_vm12, %v992_v61 }
 0x22c   : > { %1317 = vrot.lane.b32.xlu0 %v987_v57, %s2289_s13  ;;  %1152 = vrot.lane.b32.xlu1 %v988_v59, %s2287_s8 }
 0x22d   : > { %1233 = vmatprep.mubr.f32.mxu0 %v2286_v0  ;;  %1304 = vmatprep.mubr.f32.mxu1 %v2286_v0 }
 0x230   : > { %1321 = vrot.lane.b32.xlu0 %v989_v58, %s2289_s13  ;;  %1156 = vrot.lane.b32.xlu1 %v990_v60, %s2287_s8 }
 0x234   : > { %1141 = vperm.xlu0 %1995, %v991_v62   ;;  %1319 = vrot.lane.b32.xlu1 %v988_v59, %s2289_s13 }
 0x238   : > { %1323 = vrot.lane.b32.xlu1 %v990_v60, %s2289_s13 }
 0x23c   : > { %1490 = vperm.xlu1 %1996, %v1487_v63  }
 0x29a   : > { %v1151_v5 = vpop.permute.xlu1 %1150  ;;  %v1155_v6 = vpop.permute.xlu0 %1154 }
 0x29e   : > { %v1153_v7 = vpop.permute.xlu1 %1152  ;;  %v1318_v14 = vpop.permute.xlu0 %1317 }
 0x29f   : > { %v1160_v8 = vsel %vm621_vm2, %v1151_v5, %v1153_v7  ;;  %v1159_v15 = vsel %vm621_vm2, %v1153_v7, %v1155_v6 }
 0x2a0   : > { %1833 = vmatprep.subr.msk.mxu0 %vm2656_vm5, %v1160_v8 }
 0x2a2   : > { %v1157_v10 = vpop.permute.xlu1 %1156  ;;  %v1322_v18 = vpop.permute.xlu0 %1321 }
 0x2a3   : > { %v1158_v12 = vsel %vm621_vm2, %v1155_v6, %v1157_v10  ;;  %v1161_v13 = vsel %vm621_vm2, %v1157_v10, %v1151_v5 }
 0x2a4   : > { %1834 = vmatpush1.msk.msra.mxu0 %vm431_vm3, %v1161_v13  ;;  %1836 = vmatprep.subr.msk.mxu1 %vm2652_vm4, %v1158_v12 }
 0x2a5   : > { %1835 = vmatmul.mubr.msk.f32.vlgmr.msra.gmra.mrb[2].mxu0 %vm993_vm12, %v1149_v11  ;;  %1837 = vmatpush1.msk.msra.mxu1 %vm2660_vm6, %v1159_v15 }
 0x2a6   : > { %1838 = vmatmul.mubr.msk.f32.vlgmr.msra.gmra.mrb[2].mxu1 %vm993_vm12, %v1149_v11  ;;  %v1320_v16 = vpop.permute.xlu1 %1319  ;;  %1400 = vmatprep.mubr.f32.mxu0 %v2286_v0 }
 0x2a7   : > { %v1327_v17 = vsel %vm809_vm7, %v1318_v14, %v1320_v16  ;;  %1471 = vmatprep.mubr.f32.mxu1 %v2286_v0  ;;  %v1326_v23 = vsel %vm809_vm7, %v1320_v16, %v1322_v18 }
 0x2a8   : > { %1839 = vmatprep.subr.msk.mxu0 %vm2683_vm8, %v1327_v17 }
 0x2aa   : > { %v1324_v19 = vpop.permute.xlu1 %1323 }
 0x2ab   : > { %v1325_v20 = vsel %vm809_vm7, %v1322_v18, %v1324_v19  ;;  %v1328_v22 = vsel %vm809_vm7, %v1324_v19, %v1318_v14 }
 0x2ac   : > { %1840 = vmatpush1.msk.msra.mxu0 %vm435_vm9, %v1328_v22  ;;  %1842 = vmatprep.subr.msk.mxu1 %vm2702_vm11, %v1325_v20 }
 0x2ad   : > { %1841 = vmatmul.mubr.msk.f32.vlgmr.msra.gmra.mrb[2].mxu0 %vm993_vm12, %v1316_v21  ;;  %1843 = vmatpush1.msk.msra.mxu1 %vm2698_vm10, %v1326_v23 }
 0x2ae   : > { %1844 = vmatmul.mubr.msk.f32.vlgmr.msra.gmra.mrb[2].mxu1 %vm993_vm12, %v1316_v21  ;;  %1845 = vmatprep.subr.msk.mxu0 %vm449_vm0, %v2619_v4 }
 0x2af   : > { %1846 = vmatpush1.msk.msra.mxu0 %vm449_vm0, %v2607_v2  ;;  %1560 = vmatprep.mubr.f32.mxu0 %v2286_v0 }
 0x2b0   : > { %1848 = vmatprep.subr.msk.mxu1 %vm449_vm0, %v2615_v3  ;;  %1631 = vmatprep.mubr.f32.mxu1 %v2286_v0 }
 0x2b1   : > { %1847 = vmatmul.mubr.msk.f32.vlgmr.msra.gmra.mrb[4].mxu0 %vm445_vm1, %v1486_v24  ;;  %1849 = vmatpush1.msk.msra.mxu1 %vm449_vm0, %v2605_v1 }
 0x2b2   : > { %1850 = vmatmul.mubr.msk.f32.vlgmr.msra.gmra.mrb[4].mxu1 %vm445_vm1, %v1486_v24 }
 0x2b3   : > { %v1142_v4 = vpop.permute.xlu0 %1141 }
 0x2bb   : > { %v1491_v30 = vpop.permute.xlu1 %1490 }
 0x380   : > { %v1402_v9 = vpop.f32.mrb[2].mxu0 }
 0x381   : > { %v1862_v25 = vadd.f32 %v1402_v9, %v1142_v4  ;;  %v1404_v26 = vpop.f32.mrb[3].mxu0  ;;  %v1473_v2 = vpop.f32.mrb[2].mxu1 }
 0x382   : > { %v1863_v27 = vadd.f32 %v1404_v26, %v1142_v4  ;;  %v1864_v28 = vadd.f32 %v1473_v2, %v1142_v4  ;;  %v1475_v29 = vpop.f32.mrb[3].mxu1 }
 0x383   : > { %v1865_v3 = vadd.f32 %v1475_v29, %v1142_v4  ;;  %v1482_v31 = vmax.f32 %v1862_v25, 0.0 }
 0x384   : > { %v1562_v0 = vpop.f32.mrb[4].mxu0  ;;  %v1483_v1 = vmax.f32 %v1863_v27, 0.0  ;;  %v1484_v35 = vmax.f32 %v1864_v28, 0.0 }
 0x385   : > { %v1563_v32 = vadd.f32 %v1562_v0, %v1491_v30  ;;  %v1564_v33 = vpop.f32.mrb[5].mxu0  ;;  %v1633_v34 = vpop.f32.mrb[4].mxu1  ;;  %v1485_v39 = vmax.f32 %v1865_v3, 0.0 }
 0x386   : > { %v1565_v36 = vadd.f32 %v1564_v33, %v1491_v30  ;;  %v1634_v37 = vadd.f32 %v1633_v34, %v1491_v30  ;;  %v1635_v38 = vpop.f32.mrb[5].mxu1 }
 0x387   : > { %v1638_v40 = vadd.f32 %v1563_v32, %v1482_v31  ;;  %v1636_v41 = vadd.f32 %v1635_v38, %v1491_v30 }
 0x388   : > { %v1639_v42 = vadd.f32 %v1565_v36, %v1483_v1  ;;  %v1640_v43 = vadd.f32 %v1634_v37, %v1484_v35 }
 0x389   : > { %v1642_v44 = vmax.f32 %v1638_v40, 0.0  ;;  %v1641_v45 = vadd.f32 %v1636_v41, %v1485_v39 }
 0x38a   : > { %v1643_v46 = vmax.f32 %v1639_v42, 0.0  ;;  %v1644_v47 = vmax.f32 %v1640_v43, 0.0 }
 0x38b   : > { %1646 = vst [vmem:[%s373_s19] sm:$0xff] %v1642_v44  ;;  %v1645_v48 = vmax.f32 %v1641_v45, 0.0 }
 0x38c   : > { %1647 = vst [vmem:[%s373_s19 + $0x8] sm:$0xff] %v1643_v46  ;;  %1648 = vst [vmem:[%s373_s19 + $0x10] sm:$0xff] %v1644_v47 }
 0x38d   : > { %1649 = vst [vmem:[%s373_s19 + $0x18] sm:$0xff] %v1645_v48 }
 0x38e   : > { %2210 = shalt.err (!%p2207_p0)
}
 0x38f   : > { %s2211_s29 = scalar_lea.hbm %s2793_s21, 512  ;;  %s2215_s9 = scalar_lea.hbm %s2844_s7, 1024 }
 0x390   : > { %p2212_p4 = scmp.ne.s32.totalorder %s2793_s21, %s2211_s29  ;;  %p2216_p8 = scmp.lt.u32.totalorder %s2793_s21, %s2844_s7 }
 0x391   : > { %p2217_p5 = scmp.lt.u32.totalorder %s2215_s9, %s2211_s29  ;;  %p2219_p6 = scmp.lt.u32.totalorder %s2211_s29, %s2793_s21 }
 0x392   : > { %p2213_p10 = pnand %p2212_p4, %p2876_p9 }
 0x393   : > { %p2218_p7 = por %p2217_p5, %p2216_p8 }
 0x394   : > { %p2214_p11 = pneg %p2213_p10 }
 0x395   : > { %p2220_p12 = por %p2219_p6, %p2218_p7 }
 0x397   : > { %p2221_p13 = pnand %p2220_p12, %p2214_p11 }
 0x399   : > { %2224 = shalt.err (!%p2221_p13)
}
 0x39a   : > { %1908 = dma.vmem_to_hbm [thread:$0]  (%p2876_p9), %s2795_s17, 512, %s2793_s21, %s1651_s30  }
 0x39b PF: > { %s1677_s10 = sand.u32 1, %s2263_s24   ;;  %p2877_p1 = scmp.ne.s32.totalorder %s2855_s28, 0 }
 0x39c   : > { %p2878_p3 = scmp.ge.s32.totalorder %s2275_s27, 2  ;;  %s1678_s15 = scalar_lea.sflag [#allocation4], %s1677_s10 }
 0x39e   : > { %p1934_p2 = pnand %p2878_p3, %p2877_p1 }
 0x3a0   : > { %2258 = dma.done.wait (!%p1934_p2), %s1678_s15, 512  }
 0x3a1   : > { %2260 = vsyncadd (!%p1934_p2), %s1678_s15, 4294966784  ;;  %p23_p0 = scmp.ge.s32.totalorder %s2507_s11, 4   ;;  %s2879_s24 = smov %s2267_s25 }
 0x3a2   : > { %s2880_s25 = smov %s2271_s26  ;;  %s2881_s26 = smov %s2518_s18 }
 0x3a3   : > { %s2882_s27 = smov %s2507_s11  ;;  %25 = sbr.rel (!%p23_p0) target bundleno = 8 (0x8), region = 121 }
 0x3aa   :  { %1683 = vsyncpa [#allocation3], 1 }
 0x3ab   :  { %1685 = vsyncpa [#allocation3 + $0x1], 1 }
 0x3ac   :  { %1686 = vsyncpa [#allocation6], 1 }
 0x3ad   :  { %1687 = vsyncpa [#allocation9], 1 }
 0x3ae   :  { %1688 = vsyncpa [#allocation12], 1 }
 0x3af   :  { %1689 = vsyncpa [#allocation4], 1 }
 0x3b0   :  { %1691 = vsyncpa [#allocation4 + $0x1], 1 }

</bundles_post_ra>
